<compile_context>
chip_gen: v5e
topology: v5e:2x2
jax: 0.10.0
libtpu: 0.0.40
codegen_flags: <defaults>
</compile_context>

<pallas_src>
import jax
import jax.numpy as jnp
from jax.experimental import pallas as pl
from jax.experimental.pallas import tpu as pltpu

INPUT_DIM = 135
HIDDEN_DIM = 512
NUM_JOINTS = 14
ROT_DIM = NUM_JOINTS * 4          # 56
HEAD_DIM = 64                     # rot(56) + trans(3) + pad(5): lane-padded fused head
EPS = 1e-12                       # F.normalize default eps


def retarget_kernel(x_ref, w1_ref, b1_ref, w2_ref, b2_ref, wh_ref, bh_ref,
                    g_ref, out_ref):
    w_dtype = w1_ref.dtype

    # shared MLP: Linear -> ReLU -> Linear -> ReLU (MXU matmuls, f32 accumulation)
    h = jnp.dot(x_ref[...], w1_ref[...], preferred_element_type=jnp.float32)
    h = jnp.maximum(h + b1_ref[...], 0.0)
    h = jnp.dot(h.astype(w_dtype), w2_ref[...], preferred_element_type=jnp.float32)
    h = jnp.maximum(h + b2_ref[...], 0.0)

    # fused heads: (TB, 64) = [rot(56) | trans(3) | pad(5)] -- one MXU pass, one store
    y = jnp.dot(h.astype(w_dtype), wh_ref[...], preferred_element_type=jnp.float32)
    y = y + bh_ref[...]

    # per-quaternion squared norms via the precomputed block-diagonal ones matrix G
    # (zero on trans/pad lanes), then EUP rsqrt.  Non-rot lanes keep y unchanged.
    denom = jnp.dot(y * y, g_ref[...], preferred_element_type=jnp.float32)
    inv = jax.lax.rsqrt(jnp.maximum(denom, EPS * EPS))   # == 1 / max(||q||, eps)
    is_rot = jax.lax.broadcasted_iota(jnp.int32, y.shape, 1) < ROT_DIM
    out_ref[...] = jnp.where(is_rot, y * inv, y)


def _round_up(n, m):
    return ((n + m - 1) // m) * m


def prepare_params(params, matmul_dtype=jnp.bfloat16):
    """One-time parameter prep (run once per parameter set, NOT per forward call).

    Fuses the trans/rot heads into one lane-padded (512, 64) weight slab, builds the
    block-diagonal quaternion grouping matrix G (for the squared-norm matmul), and
    casts the matmul weights to `matmul_dtype` (bf16 by default for MXU throughput;
    pass jnp.float32 for strict PyTorch-matching numerics).
    """
    w1, b1, w2, b2, wt, bt, wr, br = params
    md = jnp.dtype(matmul_dtype)

    pad = HEAD_DIM - ROT_DIM - 3
    wh = jnp.concatenate([wr, wt, jnp.zeros((HIDDEN_DIM, pad), jnp.float32)], axis=1)
    bh = jnp.concatenate([br, bt, jnp.zeros((1, pad), jnp.float32)], axis=1)

    # G[i, j] = 1 iff lanes i and j belong to the same quaternion (rot lanes only)
    lane = jnp.arange(HEAD_DIM)
    grp = jnp.where(lane < ROT_DIM, lane // 4, -1)
    G = ((grp[:, None] == grp[None, :]) & (grp[:, None] >= 0)).astype(jnp.float32)

    return {
        "w1": w1.astype(md), "b1": b1,
        "w2": w2.astype(md), "b2": b2,
        "wh": wh.astype(md), "bh": bh,
        "G": G,
    }


def retarget_net(x, prepped, *, block_b=512):
    """x: (B, INPUT_DIM) f32 -> (pred_trans (B, 3), pred_rot (B, NUM_JOINTS, 4))."""
    B = x.shape[0]
    md = jnp.dtype(prepped["w1"].dtype)

    # sublane alignment for the batch tile: bf16 packs 2 rows per 32-bit sublane
    align = max(8, 8 * (4 // md.itemsize))

    if B <= 2 * align:
        tb = _round_up(B, align)                        # one small block
    else:
        # at least 2 grid steps (v7x megacore) and balance the tile over ragged B
        n_blocks = max(2, pl.cdiv(B, block_b))
        tb = _round_up(pl.cdiv(B, n_blocks), align)
    Bp = _round_up(B, tb)
    if Bp != B:
        x = jnp.pad(x, ((0, Bp - B), (0, 0)))
    num_blocks = Bp // tb

    x_in = x.astype(md)

    def resident(shape):          # weights/biases/G stay VMEM-resident across the grid
        return pl.BlockSpec(shape, lambda i: (0, 0))

    out = pl.pallas_call(
        retarget_kernel,
        out_shape=jax.ShapeDtypeStruct((Bp, HEAD_DIM), jnp.float32),
        grid=(num_blocks,),
        in_specs=[
            pl.BlockSpec((tb, INPUT_DIM), lambda i: (i, 0)),
            resident(prepped["w1"].shape), resident(prepped["b1"].shape),
            resident(prepped["w2"].shape), resident(prepped["b2"].shape),
            resident(prepped["wh"].shape), resident(prepped["bh"].shape),
            resident(prepped["G"].shape),
        ],
        out_specs=pl.BlockSpec((tb, HEAD_DIM), lambda i: (i, 0)),
        compiler_params=pltpu.CompilerParams(
            dimension_semantics=("parallel",),
            vmem_limit_bytes=32 << 20,
        ),
    )(x_in, prepped["w1"], prepped["b1"], prepped["w2"], prepped["b2"],
      prepped["wh"], prepped["bh"], prepped["G"])

    out = out[:B]
    pred_trans = out[:, ROT_DIM:ROT_DIM + 3]
    pred_rot = out[:, :ROT_DIM].reshape(B, NUM_JOINTS, 4)
    return pred_trans, pred_rot


def init_params(key):
    ks = jax.random.split(key, 8)

    def lin(kw, kb, fan_in, fan_out):
        bound = 1.0 / jnp.sqrt(fan_in)
        w = jax.random.uniform(kw, (fan_in, fan_out), jnp.float32, -bound, bound)
        b = jax.random.uniform(kb, (1, fan_out), jnp.float32, -bound, bound)
        return w, b

    w1, b1 = lin(ks[0], ks[1], INPUT_DIM, HIDDEN_DIM)
    w2, b2 = lin(ks[2], ks[3], HIDDEN_DIM, HIDDEN_DIM)
    wt, bt = lin(ks[4], ks[5], HIDDEN_DIM, 3)
    wr, br = lin(ks[6], ks[7], HIDDEN_DIM, NUM_JOINTS * 4)
    return (w1, b1, w2, b2, wt, bt, wr, br)


def reference(x, params, matmul_dtype=jnp.float32):
    w1, b1, w2, b2, wt, bt, wr, br = params
    md = matmul_dtype
    dot = lambda a, w: jnp.dot(a.astype(md), w.astype(md),
                               preferred_element_type=jnp.float32)
    h = jnp.maximum(dot(x, w1) + b1, 0.0)
    h = jnp.maximum(dot(h, w2) + b2, 0.0)
    trans = dot(h, wt) + bt
    rot = (dot(h, wr) + br).reshape(-1, NUM_JOINTS, 4)
    norm = jnp.maximum(jnp.sqrt(jnp.sum(rot * rot, axis=-1, keepdims=True)), EPS)
    return trans, rot / norm


if __name__ == "__main__":
    key = jax.random.PRNGKey(0)
    kx, kp = jax.random.split(key)
    params = init_params(kp)

    # f32 strict-numerics path (single small block), tight tolerance vs reference
    prepped_f32 = prepare_params(params, matmul_dtype=jnp.float32)
    B = 8
    x = jax.random.normal(kx, (B, INPUT_DIM), jnp.float32)
    trans, rot = retarget_net(x, prepped_f32)
    jax.block_until_ready((trans, rot))
    ref_trans, ref_rot = reference(x, params)
    assert trans.shape == (B, 3) and rot.shape == (B, NUM_JOINTS, 4)
    assert jnp.allclose(trans, ref_trans, atol=1e-4, rtol=1e-4)
    assert jnp.allclose(rot, ref_rot, atol=1e-4, rtol=1e-4)

    # default bf16 path: multi-block ragged batch (exercises tiling, padding and the
    # >=2-grid-step rule for v7x megacore), compared against a bf16 reference
    prepped = prepare_params(params)                    # bf16 matmul inputs (default)
    B2 = 48
    x2 = jax.random.normal(jax.random.PRNGKey(1), (B2, INPUT_DIM), jnp.float32)
    trans2, rot2 = retarget_net(x2, prepped, block_b=32)
    jax.block_until_ready((trans2, rot2))
    ref_trans2, ref_rot2 = reference(x2, params, matmul_dtype=jnp.bfloat16)
    assert trans2.shape == (B2, 3) and rot2.shape == (B2, NUM_JOINTS, 4)
    assert jnp.allclose(trans2, ref_trans2, atol=2e-2, rtol=2e-2)
    assert jnp.allclose(rot2, ref_rot2, atol=2e-2, rtol=2e-2)

    print("KERNEL_OK")
</pallas_src>

<mosaic_0001>
module attributes {stable_mosaic.version = 11 : i64} {
  func.func @retarget_kernel(%arg0: i32, %arg1: memref<8x135xf32, #tpu.memory_space<vmem>>, %arg2: memref<135x512xf32, #tpu.memory_space<vmem>>, %arg3: memref<1x512xf32, #tpu.memory_space<vmem>>, %arg4: memref<512x512xf32, #tpu.memory_space<vmem>>, %arg5: memref<1x512xf32, #tpu.memory_space<vmem>>, %arg6: memref<512x64xf32, #tpu.memory_space<vmem>>, %arg7: memref<1x64xf32, #tpu.memory_space<vmem>>, %arg8: memref<64x64xf32, #tpu.memory_space<vmem>>, %arg9: memref<8x64xf32, #tpu.memory_space<vmem>>) attributes {dimension_semantics = [#tpu.dimension_semantics<parallel>], iteration_bounds = array<i64: 1>, scalar_prefetch = 0 : i64, scratch_operands = 0 : i64, tpu.core_type = #tpu.core_type<tc>, window_params = [{transform_indices = @transform_0, window_bounds = array<i64: 8, 135>}, {pipeline_mode = #tpu.pipeline_mode<synchronous>, transform_indices = @transform_1, window_bounds = array<i64: 135, 512>}, {pipeline_mode = #tpu.pipeline_mode<synchronous>, transform_indices = @transform_2, window_bounds = array<i64: 1, 512>}, {pipeline_mode = #tpu.pipeline_mode<synchronous>, transform_indices = @transform_3, window_bounds = array<i64: 512, 512>}, {pipeline_mode = #tpu.pipeline_mode<synchronous>, transform_indices = @transform_4, window_bounds = array<i64: 1, 512>}, {pipeline_mode = #tpu.pipeline_mode<synchronous>, transform_indices = @transform_5, window_bounds = array<i64: 512, 64>}, {pipeline_mode = #tpu.pipeline_mode<synchronous>, transform_indices = @transform_6, window_bounds = array<i64: 1, 64>}, {pipeline_mode = #tpu.pipeline_mode<synchronous>, transform_indices = @transform_7, window_bounds = array<i64: 64, 64>}, {transform_indices = @transform_8, window_bounds = array<i64: 8, 64>}]} {
    %c0 = arith.constant 0 : index
    %c0_0 = arith.constant 0 : index
    %0 = vector.load %arg1[%c0, %c0_0] : memref<8x135xf32, #tpu.memory_space<vmem>>, vector<8x135xf32>
    %c0_1 = arith.constant 0 : index
    %c0_2 = arith.constant 0 : index
    %1 = vector.load %arg2[%c0_1, %c0_2] : memref<135x512xf32, #tpu.memory_space<vmem>>, vector<135x512xf32>
    %cst = arith.constant dense<0.000000e+00> : vector<8x512xf32>
    %2 = tpu.matmul %0, %1, %cst {dimension_numbers = #tpu.dot_dimension_numbers<[1], [0], [0], [1], [0, 0, 1, 1], [], []>} : vector<8x135xf32>, vector<135x512xf32>, vector<8x512xf32> -> vector<8x512xf32>
    %c0_3 = arith.constant 0 : index
    %c0_4 = arith.constant 0 : index
    %3 = vector.load %arg3[%c0_3, %c0_4] : memref<1x512xf32, #tpu.memory_space<vmem>>, vector<1x512xf32>
    %4 = vector.broadcast %3 : vector<1x512xf32> to vector<8x512xf32>
    %5 = arith.addf %2, %4 : vector<8x512xf32>
    %cst_5 = arith.constant 0.000000e+00 : f32
    %6 = vector.broadcast %cst_5 : f32 to vector<8x512xf32>
    %7 = arith.maximumf %5, %6 : vector<8x512xf32>
    %c0_6 = arith.constant 0 : index
    %c0_7 = arith.constant 0 : index
    %8 = vector.load %arg4[%c0_6, %c0_7] : memref<512x512xf32, #tpu.memory_space<vmem>>, vector<512x512xf32>
    %cst_8 = arith.constant dense<0.000000e+00> : vector<8x512xf32>
    %9 = tpu.matmul %7, %8, %cst_8 {dimension_numbers = #tpu.dot_dimension_numbers<[1], [0], [0], [1], [0, 0, 1, 1], [], []>} : vector<8x512xf32>, vector<512x512xf32>, vector<8x512xf32> -> vector<8x512xf32>
    %c0_9 = arith.constant 0 : index
    %c0_10 = arith.constant 0 : index
    %10 = vector.load %arg5[%c0_9, %c0_10] : memref<1x512xf32, #tpu.memory_space<vmem>>, vector<1x512xf32>
    %11 = vector.broadcast %10 : vector<1x512xf32> to vector<8x512xf32>
    %12 = arith.addf %9, %11 : vector<8x512xf32>
    %cst_11 = arith.constant 0.000000e+00 : f32
    %13 = vector.broadcast %cst_11 : f32 to vector<8x512xf32>
    %14 = arith.maximumf %12, %13 : vector<8x512xf32>
    %c0_12 = arith.constant 0 : index
    %c0_13 = arith.constant 0 : index
    %15 = vector.load %arg6[%c0_12, %c0_13] : memref<512x64xf32, #tpu.memory_space<vmem>>, vector<512x64xf32>
    %cst_14 = arith.constant dense<0.000000e+00> : vector<8x64xf32>
    %16 = tpu.matmul %14, %15, %cst_14 {dimension_numbers = #tpu.dot_dimension_numbers<[1], [0], [0], [1], [0, 0, 1, 1], [], []>} : vector<8x512xf32>, vector<512x64xf32>, vector<8x64xf32> -> vector<8x64xf32>
    %c0_15 = arith.constant 0 : index
    %c0_16 = arith.constant 0 : index
    %17 = vector.load %arg7[%c0_15, %c0_16] : memref<1x64xf32, #tpu.memory_space<vmem>>, vector<1x64xf32>
    %18 = vector.broadcast %17 : vector<1x64xf32> to vector<8x64xf32>
    %19 = arith.addf %16, %18 : vector<8x64xf32>
    %20 = arith.mulf %19, %19 : vector<8x64xf32>
    %c0_17 = arith.constant 0 : index
    %c0_18 = arith.constant 0 : index
    %21 = vector.load %arg8[%c0_17, %c0_18] : memref<64x64xf32, #tpu.memory_space<vmem>>, vector<64x64xf32>
    %cst_19 = arith.constant dense<0.000000e+00> : vector<8x64xf32>
    %22 = tpu.matmul %20, %21, %cst_19 {dimension_numbers = #tpu.dot_dimension_numbers<[1], [0], [0], [1], [0, 0, 1, 1], [], []>} : vector<8x64xf32>, vector<64x64xf32>, vector<8x64xf32> -> vector<8x64xf32>
    %cst_20 = arith.constant 1.000000e-24 : f32
    %23 = vector.broadcast %cst_20 : f32 to vector<8x64xf32>
    %24 = arith.maximumf %22, %23 : vector<8x64xf32>
    %25 = math.rsqrt %24 : vector<8x64xf32>
    %26 = tpu.iota {dimensions = array<i32: 1>} : vector<8x64xi32>
    %c56_i32 = arith.constant 56 : i32
    %27 = vector.broadcast %c56_i32 : i32 to vector<8x64xi32>
    %28 = arith.cmpi slt, %26, %27 : vector<8x64xi32>
    %29 = arith.mulf %19, %25 : vector<8x64xf32>
    %30 = arith.select %28, %29, %19 : vector<8x64xi1>, vector<8x64xf32>
    %c0_21 = arith.constant 0 : index
    %c0_22 = arith.constant 0 : index
    %31 = vector.load %arg9[%c0_21, %c0_22] : memref<8x64xf32, #tpu.memory_space<vmem>>, vector<8x64xf32>
    tpu.vector_store %arg9[%c0_21, %c0_22], %30 {strides = array<i32>} : memref<8x64xf32, #tpu.memory_space<vmem>>, vector<8x64xf32>,
    return
  }
  func.func @transform_0(%arg0: i32) -> (i32, i32) {
    %c0_i32 = arith.constant 0 : i32
    %c0_i32_0 = arith.constant 0 : i32
    return %arg0, %c0_i32 : i32, i32
  }
  func.func @transform_1(%arg0: i32) -> (i32, i32) {
    %c0_i32 = arith.constant 0 : i32
    %c0_i32_0 = arith.constant 0 : i32
    %c0_i32_1 = arith.constant 0 : i32
    return %c0_i32, %c0_i32_0 : i32, i32
  }
  func.func @transform_2(%arg0: i32) -> (i32, i32) {
    %c0_i32 = arith.constant 0 : i32
    %c0_i32_0 = arith.constant 0 : i32
    %c0_i32_1 = arith.constant 0 : i32
    return %c0_i32, %c0_i32_0 : i32, i32
  }
  func.func @transform_3(%arg0: i32) -> (i32, i32) {
    %c0_i32 = arith.constant 0 : i32
    %c0_i32_0 = arith.constant 0 : i32
    %c0_i32_1 = arith.constant 0 : i32
    return %c0_i32, %c0_i32_0 : i32, i32
  }
  func.func @transform_4(%arg0: i32) -> (i32, i32) {
    %c0_i32 = arith.constant 0 : i32
    %c0_i32_0 = arith.constant 0 : i32
    %c0_i32_1 = arith.constant 0 : i32
    return %c0_i32, %c0_i32_0 : i32, i32
  }
  func.func @transform_5(%arg0: i32) -> (i32, i32) {
    %c0_i32 = arith.constant 0 : i32
    %c0_i32_0 = arith.constant 0 : i32
    %c0_i32_1 = arith.constant 0 : i32
    return %c0_i32, %c0_i32_0 : i32, i32
  }
  func.func @transform_6(%arg0: i32) -> (i32, i32) {
    %c0_i32 = arith.constant 0 : i32
    %c0_i32_0 = arith.constant 0 : i32
    %c0_i32_1 = arith.constant 0 : i32
    return %c0_i32, %c0_i32_0 : i32, i32
  }
  func.func @transform_7(%arg0: i32) -> (i32, i32) {
    %c0_i32 = arith.constant 0 : i32
    %c0_i32_0 = arith.constant 0 : i32
    %c0_i32_1 = arith.constant 0 : i32
    return %c0_i32, %c0_i32_0 : i32, i32
  }
  func.func @transform_8(%arg0: i32) -> (i32, i32) {
    %c0_i32 = arith.constant 0 : i32
    %c0_i32_0 = arith.constant 0 : i32
    return %arg0, %c0_i32 : i32, i32
  }
}

</mosaic_0001>

<bundles_post_ra>
// kernel: tpu_custom_call.1
= control target key start
LH: loop header
LB: loop body
LE: loop exit
PB: predicated region body
PF: predicated region fallthrough
CT: control target
= control target key end

     0   :  { %13 = vsyncpa [#allocation3], 0  ;;  %s1716_s0 = inlined_call_operand.vmem [shape: f32[8,135], index: 0, kind: input, shape index: {}]   ;;  %s1717_s1 = inlined_call_operand.vmem [shape: f32[135,512], index: 1, kind: input, shape index: {}]   ;;  %s1718_s2 = inlined_call_operand.vmem [shape: f32[1,512], index: 2, kind: input, shape index: {}]   ;;  %s1719_s3 = inlined_call_operand.hbm [shape: f32[512,512], index: 3, kind: input, shape index: {}]   ;;  %s1720_s4 = inlined_call_operand.vmem [shape: f32[1,512], index: 4, kind: input, shape index: {}]   ;;  %s1721_s5 = inlined_call_operand.vmem [shape: f32[512,64], index: 5, kind: input, shape index: {}]   ;;  %s1722_s6 = inlined_call_operand.vmem [shape: f32[1,64], index: 6, kind: input, shape index: {}]   ;;  %s1723_s7 = inlined_call_operand.vmem [shape: f32[64,64], index: 7, kind: input, shape index: {}]   ;;  %s1724_s8 = inlined_call_operand.hbm [shape: f32[8,64], index: 8, kind: output, shape index: {}]  }
   0x1   :  { %14 = vsyncpa [#allocation4], 0  ;;  %s25_s29 = sshll.u32 %s1719_s3, 4  ;;  %s1180_s30 = smov [#allocation2]   ;;  %s26_s29 = int_to_ptr.hbm [resolvable:$true] %s25_s29 }
   0x2   :  { %s27_s9 = sshll.u32 %s1180_s30, 4  ;;  %s1181_s10 = smov 512   ;;  %s28_s9 = int_to_ptr.vmem [resolvable:$true] %s27_s9 }
   0x3   :  { %s1182_s11 = smov 32  }
   0x4   :  { %33 = dma.hbm_to_vmem [thread:$0]  %s26_s29, 32768, %s28_s9, [#allocation3], %s1181_s10, %s1181_s10, %s1182_s11  }
   0x5   :  { %1176 = dma.done.wait [#allocation3], 32768  }
   0x6   :  { %1177 = vsyncadd [#allocation3], 4294934528  ;;  %vm130_vm0 = vcmask 1046528   ;;  %v108_v0 = vld [vmem:[%s1717_s1 + $0x1e0] sm:$0xff]  ;;  %v109_v2 = vld [vmem:[%s1717_s1 + $0x1e8] sm:$0xff]  ;;  %vm126_vm1 = vcmask 56320  }
   0x7   :  { %v112_v1 = vld [vmem:[%s1717_s1 + $0x200] sm:$0x7f]  ;;  %143 = vmatpush.msra.mxu0 %v108_v0  ;;  %v113_v3 = vld [vmem:[%s1717_s1 + $0x208] sm:$0x7f]  ;;  %v110_v4 = vld [vmem:[%s1717_s1 + $0x1f0] sm:$0xff]  ;;  %183 = vmatpush.msra.mxu2 %v109_v2  ;;  %vm1054_vm2 = vcmask 523264  }
   0x8   :  { %1112 = vmatpush.msk.msra.mxu1 %vm130_vm0, %v112_v1  ;;  %v114_v5 = vld [vmem:[%s1717_s1 + $0x210] sm:$0x7f]  ;;  %1114 = vmatpush.msk.msra.mxu3 %vm130_vm0, %v113_v3  ;;  %v104_v6 = vld [vmem:[%s1717_s1 + $0x1c0] sm:$0xff]  ;;  %v105_v7 = vld [vmem:[%s1717_s1 + $0x1c8] sm:$0xff]  ;;  %s1102_s28 = sshll.u32 %s1724_s8, 4  ;;  %s1103_s28 = int_to_ptr.hbm [resolvable:$true] %s1102_s28 }
   0x9   :  { %v1261_v8 = vld [vmem:[%s1716_s0 + $0x8] sm:$0xff]  ;;  %v111_v9 = vld [vmem:[%s1717_s1 + $0x1f8] sm:$0xff]  ;;  %v106_v10 = vld [vmem:[%s1717_s1 + $0x1d0] sm:$0xff]  ;;  %144 = vmatpush.msra.mxu0 %v104_v6  ;;  %184 = vmatpush.msra.mxu2 %v105_v7 }
   0xa   :  { %223 = vmatpush.msrb.mxu1 %v110_v4  ;;  %1116 = vmatpush.msk.msrb.mxu3 %vm130_vm0, %v114_v5  ;;  %v100_v11 = vld [vmem:[%s1717_s1 + $0x1a0] sm:$0xff]  ;;  %v101_v12 = vld [vmem:[%s1717_s1 + $0x1a8] sm:$0xff]  ;;  %v102_v13 = vld [vmem:[%s1717_s1 + $0x1b0] sm:$0xff] }
   0xb   :  { %1115 = vmatmul.msk.f32.vlgmr.msra.gmra.mxu3 %vm126_vm1, %v1261_v8  ;;  %v107_v14 = vld [vmem:[%s1717_s1 + $0x1d8] sm:$0xff]  ;;  %v96_v15 = vld [vmem:[%s1717_s1 + $0x180] sm:$0xff]  ;;  %145 = vmatpush.msra.mxu0 %v100_v11  ;;  %v97_v16 = vld [vmem:[%s1717_s1 + $0x188] sm:$0xff] }
   0xc   :  { %224 = vmatpush.msrb.mxu1 %v106_v10  ;;  %263 = vmatpush.msra.mxu3 %v111_v9  ;;  %v98_v17 = vld [vmem:[%s1717_s1 + $0x190] sm:$0xff]  ;;  %v103_v18 = vld [vmem:[%s1717_s1 + $0x1b8] sm:$0xff]  ;;  %v92_v19 = vld [vmem:[%s1717_s1 + $0x160] sm:$0xff] }
   0xd   :  { %185 = vmatpush.msra.mxu2 %v101_v12  ;;  %146 = vmatpush.msra.mxu0 %v96_v15  ;;  %v93_v20 = vld [vmem:[%s1717_s1 + $0x168] sm:$0xff]  ;;  %v94_v21 = vld [vmem:[%s1717_s1 + $0x170] sm:$0xff]  ;;  %v99_v22 = vld [vmem:[%s1717_s1 + $0x198] sm:$0xff] }
   0xe   :  { %225 = vmatpush.msrb.mxu1 %v102_v13  ;;  %264 = vmatpush.msra.mxu3 %v107_v14  ;;  %v88_v23 = vld [vmem:[%s1717_s1 + $0x140] sm:$0xff]  ;;  %v89_v24 = vld [vmem:[%s1717_s1 + $0x148] sm:$0xff]  ;;  %v90_v25 = vld [vmem:[%s1717_s1 + $0x150] sm:$0xff] }
   0xf   :  { %186 = vmatpush.msra.mxu2 %v97_v16  ;;  %147 = vmatpush.msra.mxu0 %v92_v19  ;;  %v95_v26 = vld [vmem:[%s1717_s1 + $0x178] sm:$0xff]  ;;  %v84_v27 = vld [vmem:[%s1717_s1 + $0x120] sm:$0xff]  ;;  %v85_v28 = vld [vmem:[%s1717_s1 + $0x128] sm:$0xff] }
  0x10   :  { %226 = vmatpush.msrb.mxu1 %v98_v17  ;;  %265 = vmatpush.msra.mxu3 %v103_v18  ;;  %v86_v29 = vld [vmem:[%s1717_s1 + $0x130] sm:$0xff]  ;;  %v91_v30 = vld [vmem:[%s1717_s1 + $0x158] sm:$0xff]  ;;  %v80_v31 = vld [vmem:[%s1717_s1 + $0x100] sm:$0xff] }
  0x11   :  { %187 = vmatpush.msra.mxu2 %v93_v20  ;;  %148 = vmatpush.msra.mxu0 %v88_v23  ;;  %v81_v32 = vld [vmem:[%s1717_s1 + $0x108] sm:$0xff]  ;;  %v82_v33 = vld [vmem:[%s1717_s1 + $0x110] sm:$0xff]  ;;  %v87_v34 = vld [vmem:[%s1717_s1 + $0x138] sm:$0xff] }
  0x12   :  { %227 = vmatpush.msrb.mxu1 %v94_v21  ;;  %266 = vmatpush.msra.mxu3 %v99_v22  ;;  %v76_v35 = vld [vmem:[%s1717_s1 + $0xe0] sm:$0xff]  ;;  %v77_v36 = vld [vmem:[%s1717_s1 + $0xe8] sm:$0xff]  ;;  %v78_v37 = vld [vmem:[%s1717_s1 + $0xf0] sm:$0xff] }
  0x13   :  { %188 = vmatpush.msra.mxu2 %v89_v24  ;;  %149 = vmatpush.msra.mxu0 %v84_v27  ;;  %v83_v38 = vld [vmem:[%s1717_s1 + $0x118] sm:$0xff]  ;;  %v72_v39 = vld [vmem:[%s1717_s1 + $0xc0] sm:$0xff]  ;;  %v73_v40 = vld [vmem:[%s1717_s1 + $0xc8] sm:$0xff] }
  0x14   :  { %228 = vmatpush.msrb.mxu1 %v90_v25  ;;  %267 = vmatpush.msra.mxu3 %v95_v26  ;;  %v74_v41 = vld [vmem:[%s1717_s1 + $0xd0] sm:$0xff]  ;;  %v79_v42 = vld [vmem:[%s1717_s1 + $0xf8] sm:$0xff]  ;;  %v68_v43 = vld [vmem:[%s1717_s1 + $0xa0] sm:$0xff] }
  0x15   :  { %189 = vmatpush.msra.mxu2 %v85_v28  ;;  %150 = vmatpush.msra.mxu0 %v80_v31  ;;  %v69_v44 = vld [vmem:[%s1717_s1 + $0xa8] sm:$0xff]  ;;  %v70_v45 = vld [vmem:[%s1717_s1 + $0xb0] sm:$0xff]  ;;  %v75_v46 = vld [vmem:[%s1717_s1 + $0xd8] sm:$0xff] }
  0x16   :  { %229 = vmatpush.msrb.mxu1 %v86_v29  ;;  %268 = vmatpush.msra.mxu3 %v91_v30  ;;  %v64_v47 = vld [vmem:[%s1717_s1 + $0x80] sm:$0xff]  ;;  %v65_v48 = vld [vmem:[%s1717_s1 + $0x88] sm:$0xff]  ;;  %v66_v49 = vld [vmem:[%s1717_s1 + $0x90] sm:$0xff] }
  0x17   :  { %190 = vmatpush.msra.mxu2 %v81_v32  ;;  %151 = vmatpush.msra.mxu0 %v76_v35  ;;  %v71_v50 = vld [vmem:[%s1717_s1 + $0xb8] sm:$0xff]  ;;  %v60_v51 = vld [vmem:[%s1717_s1 + $0x60] sm:$0xff]  ;;  %v61_v52 = vld [vmem:[%s1717_s1 + $0x68] sm:$0xff] }
  0x18   :  { %230 = vmatpush.msrb.mxu1 %v82_v33  ;;  %269 = vmatpush.msra.mxu3 %v87_v34  ;;  %v67_v53 = vld [vmem:[%s1717_s1 + $0x98] sm:$0xff]  ;;  %v62_v54 = vld [vmem:[%s1717_s1 + $0x70] sm:$0xff]  ;;  %v56_v55 = vld [vmem:[%s1717_s1 + $0x40] sm:$0xff] }
  0x19   :  { %191 = vmatpush.msra.mxu2 %v77_v36  ;;  %152 = vmatpush.msra.mxu0 %v72_v39  ;;  %v57_v56 = vld [vmem:[%s1717_s1 + $0x48] sm:$0xff]  ;;  %v63_v57 = vld [vmem:[%s1717_s1 + $0x78] sm:$0xff]  ;;  %v58_v58 = vld [vmem:[%s1717_s1 + $0x50] sm:$0xff] }
  0x1a   :  { %231 = vmatpush.msrb.mxu1 %v78_v37  ;;  %270 = vmatpush.msra.mxu3 %v83_v38  ;;  %v52_v59 = vld [vmem:[%s1717_s1 + $0x20] sm:$0xff]  ;;  %v53_v60 = vld [vmem:[%s1717_s1 + $0x28] sm:$0xff]  ;;  %v59_v61 = vld [vmem:[%s1717_s1 + $0x58] sm:$0xff] }
  0x1b   :  { %192 = vmatpush.msra.mxu2 %v73_v40  ;;  %153 = vmatpush.msra.mxu0 %v68_v43  ;;  %v54_v62 = vld [vmem:[%s1717_s1 + $0x30] sm:$0xff]  ;;  %v48_v63 = vld [vmem:[%s1717_s1] sm:$0xff]  ;;  %v49_v0 = vld [vmem:[%s1717_s1 + $0x8] sm:$0xff] }
  0x1c   :  { %232 = vmatpush.msrb.mxu1 %v74_v41  ;;  %271 = vmatpush.msra.mxu3 %v79_v42  ;;  %v55_v1 = vld [vmem:[%s1717_s1 + $0x38] sm:$0xff]  ;;  %v46_v2 = vld [vmem:[%s1716_s0] sm:$0xff]  ;;  %v50_v3 = vld [vmem:[%s1717_s1 + $0x10] sm:$0xff] }
  0x1d   :  { %193 = vmatpush.msra.mxu2 %v69_v44  ;;  %154 = vmatpush.msra.mxu0 %v64_v47  ;;  %v51_v4 = vld [vmem:[%s1717_s1 + $0x18] sm:$0xff]  ;;  %v367_v6 = vld [vmem:[#allocation2 + $0x1e0] sm:$0xff] }
  0x1e   :  { %233 = vmatpush.msrb.mxu1 %v70_v45  ;;  %272 = vmatpush.msra.mxu3 %v75_v46  ;;  %v115_v5 = vld [vmem:[%s1717_s1 + $0x218] sm:$0x7f]  ;;  %v495_v7 = vld [vmem:[#allocation2 + $0x5e0] sm:$0xff] }
  0x1f   :  { %194 = vmatpush.msra.mxu2 %v65_v48  ;;  %155 = vmatpush.msra.mxu0 %v60_v51  ;;  %v431_v9 = vld [vmem:[#allocation2 + $0x3e0] sm:$0xff] }
  0x20   :  { %234 = vmatpush.msrb.mxu1 %v66_v49  ;;  %273 = vmatpush.msra.mxu3 %v71_v50  ;;  %v363_v10 = vld [vmem:[#allocation2 + $0x1c0] sm:$0xff] }
  0x21   :  { %1113 = vmatmul.msk.f32.vlgmr.msra.gmra.mxu1 %vm126_vm1, %v1261_v8  ;;  %195 = vmatpush.msra.mxu2 %v61_v52  ;;  %v559_v11 = vld [vmem:[#allocation2 + $0x7e0] sm:$0xff] }
  0x22   :  { %274 = vmatpush.msra.mxu3 %v67_v53  ;;  %235 = vmatpush.msrb.mxu1 %v62_v54  ;;  %v491_v12 = vld [vmem:[#allocation2 + $0x5c0] sm:$0xff] }
  0x23   :  { %1117 = vmatmul.msk.f32.vlgmr.msrb.gmra.mxu3 %vm126_vm1, %v1261_v8  ;;  %156 = vmatpush.msra.mxu0 %v56_v55  ;;  %v427_v13 = vld [vmem:[#allocation2 + $0x3c0] sm:$0xff] }
  0x24   :  { %196 = vmatpush.msra.mxu2 %v57_v56  ;;  %275 = vmatpush.msra.mxu3 %v63_v57  ;;  %v359_v14 = vld [vmem:[#allocation2 + $0x1a0] sm:$0xff] }
  0x25   :  { %236 = vmatpush.msrb.mxu1 %v58_v58  ;;  %157 = vmatpush.msra.mxu0 %v52_v59  ;;  %v555_v15 = vld [vmem:[#allocation2 + $0x7c0] sm:$0xff] }
  0x26   :  { %197 = vmatpush.msra.mxu2 %v53_v60  ;;  %276 = vmatpush.msra.mxu3 %v59_v61  ;;  %v423_v16 = vld [vmem:[#allocation2 + $0x3a0] sm:$0xff] }
  0x27   :  { %237 = vmatpush.msrb.mxu1 %v54_v62  ;;  %158 = vmatpush.msra.mxu0 %v48_v63  ;;  %v487_v17 = vld [vmem:[#allocation2 + $0x5a0] sm:$0xff]  ;;  %v368_v62 = vld [vmem:[#allocation2 + $0x1e8] sm:$0xff] }
  0x28   :  { %198 = vmatpush.msra.mxu2 %v49_v0  ;;  %277 = vmatpush.msra.mxu3 %v55_v1  ;;  %v355_v18 = vld [vmem:[#allocation2 + $0x180] sm:$0xff] }
  0x29   :  { %159 = vmatmul.f32.vlgmr.msra.gmra.mxu0 %v46_v2  ;;  %199 = vmatmul.f32.vlgmr.msra.gmra.mxu2 %v46_v2  ;;  %v419_v19 = vld [vmem:[#allocation2 + $0x380] sm:$0xff] }
  0x2a   :  { %238 = vmatpush.msrb.mxu1 %v50_v3  ;;  %278 = vmatpush.msra.mxu3 %v51_v4  ;;  %v551_v20 = vld [vmem:[#allocation2 + $0x7a0] sm:$0xff]  ;;  %v364_v3 = vld [vmem:[#allocation2 + $0x1c8] sm:$0xff] }
  0x2b   :  { %239 = vmatmul.f32.vlgmr.msrb.gmra.mxu1 %v46_v2  ;;  %279 = vmatmul.f32.vlgmr.msra.gmra.mxu3 %v46_v2  ;;  %v483_v21 = vld [vmem:[#allocation2 + $0x580] sm:$0xff]  ;;  %v496_v2 = vld [vmem:[#allocation2 + $0x5e8] sm:$0xff] }
  0x2c   :  { %1118 = vmatpush.msk.msrb.mxu0 %vm130_vm0, %v115_v5  ;;  %573 = vmatpush.msrb.mxu2 %v367_v6  ;;  %v351_v22 = vld [vmem:[#allocation2 + $0x160] sm:$0xff]  ;;  %v492_v6 = vld [vmem:[#allocation2 + $0x5c8] sm:$0xff] }
  0x2d   :  { %593 = vmatpush.msra.mxu1 %v431_v9  ;;  %633 = vmatpush.msrb.mxu3 %v559_v11  ;;  %v415_v23 = vld [vmem:[#allocation2 + $0x360] sm:$0xff]  ;;  %v488_v11 = vld [vmem:[#allocation2 + $0x5a8] sm:$0xff] }
  0x2e   :  { %613 = vmatpush.msra.mxu0 %v495_v7  ;;  %574 = vmatpush.msrb.mxu2 %v363_v10  ;;  %v547_v24 = vld [vmem:[#allocation2 + $0x780] sm:$0xff]  ;;  %v360_v7 = vld [vmem:[#allocation2 + $0x1a8] sm:$0xff] }
  0x2f   :  { %594 = vmatpush.msra.mxu1 %v427_v13  ;;  %634 = vmatpush.msrb.mxu3 %v555_v15  ;;  %v479_v25 = vld [vmem:[#allocation2 + $0x560] sm:$0xff]  ;;  %v432_v13 = vld [vmem:[#allocation2 + $0x3e8] sm:$0xff] }
  0x30   :  { %614 = vmatpush.msra.mxu0 %v491_v12  ;;  %575 = vmatpush.msrb.mxu2 %v359_v14  ;;  %v347_v26 = vld [vmem:[#allocation2 + $0x140] sm:$0xff]  ;;  %v356_v12 = vld [vmem:[#allocation2 + $0x188] sm:$0xff] }
  0x31   :  { %1119 = vmatmul.msk.f32.vlgmr.msrb.gmra.mxu0 %vm126_vm1, %v1261_v8  ;;  %595 = vmatpush.msra.mxu1 %v423_v16  ;;  %v411_v27 = vld [vmem:[#allocation2 + $0x340] sm:$0xff]  ;;  %v484_v15 = vld [vmem:[#allocation2 + $0x588] sm:$0xff] }
  0x32   :  { %615 = vmatpush.msra.mxu0 %v487_v17  ;;  %576 = vmatpush.msrb.mxu2 %v355_v18  ;;  %v543_v28 = vld [vmem:[#allocation2 + $0x760] sm:$0xff]  ;;  %v352_v16 = vld [vmem:[#allocation2 + $0x168] sm:$0xff] }
  0x33   :  { %596 = vmatpush.msra.mxu1 %v419_v19  ;;  %635 = vmatpush.msrb.mxu3 %v551_v20  ;;  %v475_v29 = vld [vmem:[#allocation2 + $0x540] sm:$0xff]  ;;  %v428_v17 = vld [vmem:[#allocation2 + $0x3c8] sm:$0xff] }
  0x34   :  { %616 = vmatpush.msra.mxu0 %v483_v21  ;;  %577 = vmatpush.msrb.mxu2 %v351_v22  ;;  %v343_v30 = vld [vmem:[#allocation2 + $0x120] sm:$0xff]  ;;  %v560_v18 = vld [vmem:[#allocation2 + $0x7e8] sm:$0xff] }
  0x35   :  { %597 = vmatpush.msra.mxu1 %v415_v23  ;;  %636 = vmatpush.msrb.mxu3 %v547_v24  ;;  %v407_v8 = vld [vmem:[#allocation2 + $0x320] sm:$0xff]  ;;  %v480_v19 = vld [vmem:[#allocation2 + $0x568] sm:$0xff] }
  0x36   :  { %617 = vmatpush.msra.mxu0 %v479_v25  ;;  %578 = vmatpush.msrb.mxu2 %v347_v26  ;;  %v539_v31 = vld [vmem:[#allocation2 + $0x740] sm:$0xff]  ;;  %v348_v20 = vld [vmem:[#allocation2 + $0x148] sm:$0xff] }
  0x37   :  { %v471_v32 = vld [vmem:[#allocation2 + $0x520] sm:$0xff]  ;;  %598 = vmatpush.msra.mxu1 %v411_v27  ;;  %637 = vmatpush.msrb.mxu3 %v543_v28  ;;  %v424_v21 = vld [vmem:[#allocation2 + $0x3a8] sm:$0xff] }
  0x38   :  { %v339_v33 = vld [vmem:[#allocation2 + $0x100] sm:$0xff]  ;;  %618 = vmatpush.msra.mxu0 %v475_v29  ;;  %579 = vmatpush.msrb.mxu2 %v343_v30  ;;  %v556_v22 = vld [vmem:[#allocation2 + $0x7c8] sm:$0xff] }
  0x39   :  { %v403_v34 = vld [vmem:[#allocation2 + $0x300] sm:$0xff]  ;;  %599 = vmatpush.msra.mxu1 %v407_v8  ;;  %638 = vmatpush.msrb.mxu3 %v539_v31  ;;  %v476_v23 = vld [vmem:[#allocation2 + $0x548] sm:$0xff] }
  0x3a   :  { %v535_v35 = vld [vmem:[#allocation2 + $0x720] sm:$0xff]  ;;  %619 = vmatpush.msra.mxu0 %v471_v32  ;;  %580 = vmatpush.msrb.mxu2 %v339_v33  ;;  %v344_v24 = vld [vmem:[#allocation2 + $0x128] sm:$0xff] }
  0x3b   :  { %v467_v36 = vld [vmem:[#allocation2 + $0x500] sm:$0xff]  ;;  %600 = vmatpush.msra.mxu1 %v403_v34  ;;  %639 = vmatpush.msrb.mxu3 %v535_v35  ;;  %v420_v25 = vld [vmem:[#allocation2 + $0x388] sm:$0xff] }
  0x3c   :  { %v335_v37 = vld [vmem:[#allocation2 + $0xe0] sm:$0xff]  ;;  %620 = vmatpush.msra.mxu0 %v467_v36  ;;  %v552_v26 = vld [vmem:[#allocation2 + $0x7a8] sm:$0xff] }
  0x3d   :  { %v399_v38 = vld [vmem:[#allocation2 + $0x2e0] sm:$0xff]  ;;  %581 = vmatpush.msrb.mxu2 %v335_v37  ;;  %v472_v27 = vld [vmem:[#allocation2 + $0x528] sm:$0xff] }
  0x3e   :  { %v531_v39 = vld [vmem:[#allocation2 + $0x700] sm:$0xff]  ;;  %601 = vmatpush.msra.mxu1 %v399_v38  ;;  %v340_v28 = vld [vmem:[#allocation2 + $0x108] sm:$0xff] }
  0x3f   :  { %v463_v40 = vld [vmem:[#allocation2 + $0x4e0] sm:$0xff]  ;;  %640 = vmatpush.msrb.mxu3 %v531_v39  ;;  %v416_v29 = vld [vmem:[#allocation2 + $0x368] sm:$0xff] }
  0x40   :  { %v331_v41 = vld [vmem:[#allocation2 + $0xc0] sm:$0xff]  ;;  %621 = vmatpush.msra.mxu0 %v463_v40  ;;  %v548_v30 = vld [vmem:[#allocation2 + $0x788] sm:$0xff] }
  0x41   :  { %v395_v42 = vld [vmem:[#allocation2 + $0x2c0] sm:$0xff]  ;;  %582 = vmatpush.msrb.mxu2 %v331_v41  ;;  %v468_v8 = vld [vmem:[#allocation2 + $0x508] sm:$0xff] }
  0x42   :  { %v527_v43 = vld [vmem:[#allocation2 + $0x6e0] sm:$0xff]  ;;  %602 = vmatpush.msra.mxu1 %v395_v42  ;;  %v336_v31 = vld [vmem:[#allocation2 + $0xe8] sm:$0xff] }
  0x43   :  { %v459_v44 = vld [vmem:[#allocation2 + $0x4c0] sm:$0xff]  ;;  %641 = vmatpush.msrb.mxu3 %v527_v43  ;;  %v412_v32 = vld [vmem:[#allocation2 + $0x348] sm:$0xff] }
  0x44   :  { %v327_v45 = vld [vmem:[#allocation2 + $0xa0] sm:$0xff]  ;;  %622 = vmatpush.msra.mxu0 %v459_v44  ;;  %v544_v33 = vld [vmem:[#allocation2 + $0x768] sm:$0xff] }
  0x45   :  { %v391_v46 = vld [vmem:[#allocation2 + $0x2a0] sm:$0xff]  ;;  %583 = vmatpush.msrb.mxu2 %v327_v45  ;;  %v464_v34 = vld [vmem:[#allocation2 + $0x4e8] sm:$0xff] }
  0x46   :  { %v523_v47 = vld [vmem:[#allocation2 + $0x6c0] sm:$0xff]  ;;  %603 = vmatpush.msra.mxu1 %v391_v46  ;;  %v332_v35 = vld [vmem:[#allocation2 + $0xc8] sm:$0xff] }
  0x47   :  { %v455_v48 = vld [vmem:[#allocation2 + $0x4a0] sm:$0xff]  ;;  %642 = vmatpush.msrb.mxu3 %v523_v47  ;;  %v408_v36 = vld [vmem:[#allocation2 + $0x328] sm:$0xff] }
  0x48   :  { %v323_v49 = vld [vmem:[#allocation2 + $0x80] sm:$0xff]  ;;  %623 = vmatpush.msra.mxu0 %v455_v48  ;;  %v540_v37 = vld [vmem:[#allocation2 + $0x748] sm:$0xff] }
  0x49   :  { %v387_v50 = vld [vmem:[#allocation2 + $0x280] sm:$0xff]  ;;  %584 = vmatpush.msrb.mxu2 %v323_v49  ;;  %v460_v38 = vld [vmem:[#allocation2 + $0x4c8] sm:$0xff] }
  0x4a   :  { %v519_v51 = vld [vmem:[#allocation2 + $0x6a0] sm:$0xff]  ;;  %604 = vmatpush.msra.mxu1 %v387_v50  ;;  %v328_v39 = vld [vmem:[#allocation2 + $0xa8] sm:$0xff] }
  0x4b   :  { %v451_v52 = vld [vmem:[#allocation2 + $0x480] sm:$0xff]  ;;  %643 = vmatpush.msrb.mxu3 %v519_v51  ;;  %v404_v40 = vld [vmem:[#allocation2 + $0x308] sm:$0xff] }
  0x4c   :  { %v319_v53 = vld [vmem:[#allocation2 + $0x60] sm:$0xff]  ;;  %624 = vmatpush.msra.mxu0 %v451_v52  ;;  %v536_v41 = vld [vmem:[#allocation2 + $0x728] sm:$0xff] }
  0x4d   :  { %v383_v54 = vld [vmem:[#allocation2 + $0x260] sm:$0xff]  ;;  %585 = vmatpush.msrb.mxu2 %v319_v53  ;;  %v456_v42 = vld [vmem:[#allocation2 + $0x4a8] sm:$0xff] }
  0x4e   :  { %v515_v55 = vld [vmem:[#allocation2 + $0x680] sm:$0xff]  ;;  %605 = vmatpush.msra.mxu1 %v383_v54  ;;  %v324_v43 = vld [vmem:[#allocation2 + $0x88] sm:$0xff] }
  0x4f   :  { %v447_v56 = vld [vmem:[#allocation2 + $0x460] sm:$0xff]  ;;  %644 = vmatpush.msrb.mxu3 %v515_v55  ;;  %v400_v44 = vld [vmem:[#allocation2 + $0x2e8] sm:$0xff] }
  0x50   :  { %v315_v57 = vld [vmem:[#allocation2 + $0x40] sm:$0xff]  ;;  %625 = vmatpush.msra.mxu0 %v447_v56  ;;  %v532_v45 = vld [vmem:[#allocation2 + $0x708] sm:$0xff] }
  0x51   :  { %v443_v58 = vld [vmem:[#allocation2 + $0x440] sm:$0xff]  ;;  %586 = vmatpush.msrb.mxu2 %v315_v57  ;;  %v452_v46 = vld [vmem:[#allocation2 + $0x488] sm:$0xff] }
  0x52   :  { %v311_v59 = vld [vmem:[#allocation2 + $0x20] sm:$0xff]  ;;  %626 = vmatpush.msra.mxu0 %v443_v58  ;;  %v320_v47 = vld [vmem:[#allocation2 + $0x68] sm:$0xff] }
  0x53   :  { %v439_v60 = vld [vmem:[#allocation2 + $0x420] sm:$0xff]  ;;  %587 = vmatpush.msrb.mxu2 %v311_v59  ;;  %v396_v48 = vld [vmem:[#allocation2 + $0x2c8] sm:$0xff] }
  0x54   :  { %v307_v61 = vld [vmem:[#allocation2] sm:$0xff]  ;;  %627 = vmatpush.msra.mxu0 %v439_v60  ;;  %v528_v49 = vld [vmem:[#allocation2 + $0x6e8] sm:$0xff] }
  0x55   :  { %v435_v63 = vld [vmem:[#allocation2 + $0x400] sm:$0xff]  ;;  %588 = vmatpush.msrb.mxu2 %v307_v61  ;;  %v448_v50 = vld [vmem:[#allocation2 + $0x468] sm:$0xff] }
  0x56   :  { %628 = vmatpush.msra.mxu0 %v435_v63  ;;  %v379_v0 = vld [vmem:[#allocation2 + $0x240] sm:$0xff]  ;;  %v316_v51 = vld [vmem:[#allocation2 + $0x48] sm:$0xff] }
  0x57   :  { %653 = vmatpush.msra.mxu2 %v368_v62  ;;  %v511_v1 = vld [vmem:[#allocation2 + $0x660] sm:$0xff]  ;;  %606 = vmatpush.msra.mxu1 %v379_v0  ;;  %v392_v52 = vld [vmem:[#allocation2 + $0x2a8] sm:$0xff] }
  0x58   :  { %645 = vmatpush.msrb.mxu3 %v511_v1  ;;  %v375_v4 = vld [vmem:[#allocation2 + $0x220] sm:$0xff]  ;;  %693 = vmatpush.msrb.mxu0 %v496_v2  ;;  %v524_v53 = vld [vmem:[#allocation2 + $0x6c8] sm:$0xff] }
  0x59   :  { %v507_v5 = vld [vmem:[#allocation2 + $0x640] sm:$0xff]  ;;  %654 = vmatpush.msra.mxu2 %v364_v3  ;;  %607 = vmatpush.msra.mxu1 %v375_v4  ;;  %v444_v54 = vld [vmem:[#allocation2 + $0x448] sm:$0xff] }
  0x5a   :  { %v371_v9 = vld [vmem:[#allocation2 + $0x200] sm:$0xff]  ;;  %646 = vmatpush.msrb.mxu3 %v507_v5  ;;  %694 = vmatpush.msrb.mxu0 %v492_v6  ;;  %v312_v55 = vld [vmem:[#allocation2 + $0x28] sm:$0xff] }
  0x5b   :  { %v503_v10 = vld [vmem:[#allocation2 + $0x620] sm:$0xff]  ;;  %655 = vmatpush.msra.mxu2 %v360_v7  ;;  %608 = vmatpush.msra.mxu1 %v371_v9  ;;  %v388_v56 = vld [vmem:[#allocation2 + $0x288] sm:$0xff] }
  0x5c   :  { %v499_v14 = vld [vmem:[#allocation2 + $0x600] sm:$0xff]  ;;  %647 = vmatpush.msrb.mxu3 %v503_v10  ;;  %695 = vmatpush.msrb.mxu0 %v488_v11  ;;  %v520_v57 = vld [vmem:[#allocation2 + $0x6a8] sm:$0xff] }
  0x5d   :  { %656 = vmatpush.msra.mxu2 %v356_v12  ;;  %673 = vmatpush.msrb.mxu1 %v432_v13  ;;  %v440_v58 = vld [vmem:[#allocation2 + $0x428] sm:$0xff]  ;;  %v116_v9 = vld [vmem:[%s1718_s2] sm:$0xf] }
  0x5e   :  { %648 = vmatpush.msrb.mxu3 %v499_v14  ;;  %696 = vmatpush.msrb.mxu0 %v484_v15  ;;  %v308_v59 = vld [vmem:[#allocation2 + $0x8] sm:$0xff]  ;;  %v118_v10 = vperm.slane %v116_v9, 0  ;;  %v120_v11 = vperm.slane %v116_v9, 2 }
  0x5f   :  { %657 = vmatpush.msra.mxu2 %v352_v16  ;;  %674 = vmatpush.msrb.mxu1 %v428_v17  ;;  %v384_v60 = vld [vmem:[#allocation2 + $0x268] sm:$0xff] }
  0x60   :  { %713 = vmatpush.msra.mxu3 %v560_v18  ;;  %697 = vmatpush.msrb.mxu0 %v480_v19  ;;  %v516_v61 = vld [vmem:[#allocation2 + $0x688] sm:$0xff]  ;;  %v119_v18 = vperm.slane %v116_v9, 1 }
  0x61   :  { %658 = vmatpush.msra.mxu2 %v348_v20  ;;  %675 = vmatpush.msrb.mxu1 %v424_v21  ;;  %v436_v62 = vld [vmem:[#allocation2 + $0x408] sm:$0xff]  ;;  %v369_v21 = vld [vmem:[#allocation2 + $0x1f0] sm:$0xff] }
  0x62   :  { %714 = vmatpush.msra.mxu3 %v556_v22  ;;  %698 = vmatpush.msrb.mxu0 %v476_v23  ;;  %v380_v63 = vld [vmem:[#allocation2 + $0x248] sm:$0xff]  ;;  %v121_v22 = vperm.slane %v116_v9, 3  ;;  %v321_v9 = vld [vmem:[#allocation2 + $0x70] sm:$0xff] }
  0x63   :  { %659 = vmatpush.msra.mxu2 %v344_v24  ;;  %676 = vmatpush.msrb.mxu1 %v420_v25  ;;  %v512_v0 = vld [vmem:[#allocation2 + $0x668] sm:$0xff] }
  0x64   :  { %715 = vmatpush.msra.mxu3 %v552_v26  ;;  %699 = vmatpush.msrb.mxu0 %v472_v27  ;;  %v376_v1 = vld [vmem:[#allocation2 + $0x228] sm:$0xff]  ;;  %v497_v26 = vld [vmem:[#allocation2 + $0x5f0] sm:$0xff] }
  0x65   :  { %660 = vmatpush.msra.mxu2 %v340_v28  ;;  %677 = vmatpush.msrb.mxu1 %v416_v29  ;;  %v508_v2 = vld [vmem:[#allocation2 + $0x648] sm:$0xff]  ;;  %v365_v27 = vld [vmem:[#allocation2 + $0x1d0] sm:$0xff] }
  0x66   :  { %716 = vmatpush.msra.mxu3 %v548_v30  ;;  %700 = vmatpush.msrb.mxu0 %v468_v8  ;;  %v372_v3 = vld [vmem:[#allocation2 + $0x208] sm:$0xff] }
  0x67   :  { %661 = vmatpush.msra.mxu2 %v336_v31  ;;  %678 = vmatpush.msrb.mxu1 %v412_v32  ;;  %v504_v4 = vld [vmem:[#allocation2 + $0x628] sm:$0xff]  ;;  %v493_v31 = vld [vmem:[#allocation2 + $0x5d0] sm:$0xff] }
  0x68   :  { %717 = vmatpush.msra.mxu3 %v544_v33  ;;  %701 = vmatpush.msrb.mxu0 %v464_v34  ;;  %v500_v5 = vld [vmem:[#allocation2 + $0x608] sm:$0xff]  ;;  %v361_v32 = vld [vmem:[#allocation2 + $0x1b0] sm:$0xff] }
  0x69   :  { %662 = vmatpush.msra.mxu2 %v332_v35  ;;  %679 = vmatpush.msrb.mxu1 %v408_v36  ;;  %v489_v35 = vld [vmem:[#allocation2 + $0x5b0] sm:$0xff] }
  0x6a   :  { %718 = vmatpush.msra.mxu3 %v540_v37  ;;  %702 = vmatpush.msrb.mxu0 %v460_v38  ;;  %v357_v36 = vld [vmem:[#allocation2 + $0x190] sm:$0xff] }
  0x6b   :  { %663 = vmatpush.msra.mxu2 %v328_v39  ;;  %680 = vmatpush.msrb.mxu1 %v404_v40  ;;  %v433_v37 = vld [vmem:[#allocation2 + $0x3f0] sm:$0xff] }
  0x6c   :  { %719 = vmatpush.msra.mxu3 %v536_v41  ;;  %703 = vmatpush.msrb.mxu0 %v456_v42  ;;  %v485_v39 = vld [vmem:[#allocation2 + $0x590] sm:$0xff] }
  0x6d   :  { %664 = vmatpush.msra.mxu2 %v324_v43  ;;  %681 = vmatpush.msrb.mxu1 %v400_v44  ;;  %v353_v40 = vld [vmem:[#allocation2 + $0x170] sm:$0xff] }
  0x6e   :  { %720 = vmatpush.msra.mxu3 %v532_v45  ;;  %704 = vmatpush.msrb.mxu0 %v452_v46  ;;  %v429_v41 = vld [vmem:[#allocation2 + $0x3d0] sm:$0xff] }
  0x6f   :  { %665 = vmatpush.msra.mxu2 %v320_v47  ;;  %682 = vmatpush.msrb.mxu1 %v396_v48  ;;  %v561_v42 = vld [vmem:[#allocation2 + $0x7f0] sm:$0xff] }
  0x70   :  { %721 = vmatpush.msra.mxu3 %v528_v49  ;;  %705 = vmatpush.msrb.mxu0 %v448_v50  ;;  %v481_v43 = vld [vmem:[#allocation2 + $0x570] sm:$0xff] }
  0x71   :  { %666 = vmatpush.msra.mxu2 %v316_v51  ;;  %683 = vmatpush.msrb.mxu1 %v392_v52  ;;  %v349_v44 = vld [vmem:[#allocation2 + $0x150] sm:$0xff] }
  0x72   :  { %722 = vmatpush.msra.mxu3 %v524_v53  ;;  %706 = vmatpush.msrb.mxu0 %v444_v54  ;;  %v425_v45 = vld [vmem:[#allocation2 + $0x3b0] sm:$0xff] }
  0x73   :  { %667 = vmatpush.msra.mxu2 %v312_v55  ;;  %684 = vmatpush.msrb.mxu1 %v388_v56  ;;  %v557_v46 = vld [vmem:[#allocation2 + $0x7d0] sm:$0xff] }
  0x74   :  { %723 = vmatpush.msra.mxu3 %v520_v57  ;;  %707 = vmatpush.msrb.mxu0 %v440_v58  ;;  %v477_v47 = vld [vmem:[#allocation2 + $0x550] sm:$0xff] }
  0x75   :  { %668 = vmatpush.msra.mxu2 %v308_v59  ;;  %685 = vmatpush.msrb.mxu1 %v384_v60  ;;  %v345_v48 = vld [vmem:[#allocation2 + $0x130] sm:$0xff] }
  0x76   :  { %724 = vmatpush.msra.mxu3 %v516_v61  ;;  %708 = vmatpush.msrb.mxu0 %v436_v62  ;;  %v421_v49 = vld [vmem:[#allocation2 + $0x390] sm:$0xff] }
  0x77   :  { %686 = vmatpush.msrb.mxu1 %v380_v63  ;;  %v553_v50 = vld [vmem:[#allocation2 + $0x7b0] sm:$0xff] }
  0x78   :  { %725 = vmatpush.msra.mxu3 %v512_v0  ;;  %v473_v51 = vld [vmem:[#allocation2 + $0x530] sm:$0xff] }
  0x79   :  { %687 = vmatpush.msrb.mxu1 %v376_v1  ;;  %v341_v52 = vld [vmem:[#allocation2 + $0x110] sm:$0xff] }
  0x7a   :  { %726 = vmatpush.msra.mxu3 %v508_v2  ;;  %v417_v53 = vld [vmem:[#allocation2 + $0x370] sm:$0xff] }
  0x7b   :  { %688 = vmatpush.msrb.mxu1 %v372_v3  ;;  %v549_v54 = vld [vmem:[#allocation2 + $0x790] sm:$0xff] }
  0x7c   :  { %727 = vmatpush.msra.mxu3 %v504_v4  ;;  %v469_v55 = vld [vmem:[#allocation2 + $0x510] sm:$0xff] }
  0x7d   :  { %v337_v56 = vld [vmem:[#allocation2 + $0xf0] sm:$0xff] }
  0x7e   :  { %728 = vmatpush.msra.mxu3 %v500_v5  ;;  %v413_v57 = vld [vmem:[#allocation2 + $0x350] sm:$0xff] }
  0x7f   :  { %v545_v58 = vld [vmem:[#allocation2 + $0x770] sm:$0xff] }
  0x80   :  { %v465_v59 = vld [vmem:[#allocation2 + $0x4f0] sm:$0xff] }
  0x81   :  { %v333_v60 = vld [vmem:[#allocation2 + $0xd0] sm:$0xff] }
  0x82   :  { %v409_v61 = vld [vmem:[#allocation2 + $0x330] sm:$0xff] }
  0x83   :  { %v541_v62 = vld [vmem:[#allocation2 + $0x750] sm:$0xff] }
  0x84   :  { %v461_v63 = vld [vmem:[#allocation2 + $0x4d0] sm:$0xff] }
  0x85   :  { %v329_v0 = vld [vmem:[#allocation2 + $0xb0] sm:$0xff] }
  0x86   :  { %v405_v1 = vld [vmem:[#allocation2 + $0x310] sm:$0xff] }
  0x87   :  { %v537_v2 = vld [vmem:[#allocation2 + $0x730] sm:$0xff] }
  0x88   :  { %v457_v3 = vld [vmem:[#allocation2 + $0x4b0] sm:$0xff] }
  0x89   :  { %v325_v4 = vld [vmem:[#allocation2 + $0x90] sm:$0xff] }
  0x8a   :  { %v401_v5 = vld [vmem:[#allocation2 + $0x2f0] sm:$0xff] }
  0x8e   :  { %v220_v6 = vpop.f32.mrf.mxu3 }
  0x9e   :  { %v180_v7 = vpop.f32.mrf.mxu1 }
  0xa6   :  { %v160_v12 = vpop.f32.mrf.mxu0  ;;  %v260_v13 = vpop.f32.mrf.mxu3 }
  0xa7   :  { %v161_v14 = vadd.f32 %v160_v12, %v118_v10  ;;  %v397_v10 = vld [vmem:[#allocation2 + $0x2d0] sm:$0xff] }
  0xa8   :  { %v240_v15 = vpop.f32.mrf.mxu1  ;;  %v449_v12 = vld [vmem:[#allocation2 + $0x470] sm:$0xff] }
  0xa9   :  { %v181_v16 = vadd.f32 %v180_v7, %v161_v14  ;;  %v241_v17 = vadd.f32 %v240_v15, %v120_v11  ;;  %v453_v7 = vld [vmem:[#allocation2 + $0x490] sm:$0xff] }
  0xaa   :  { %v529_v11 = vld [vmem:[#allocation2 + $0x6f0] sm:$0xff] }
  0xab   :  { %v1459_v19 = vmax.f32 %v181_v16, 0.0  ;;  %v261_v20 = vadd.f32 %v260_v13, %v241_v17  ;;  %v317_v13 = vld [vmem:[#allocation2 + $0x50] sm:$0xff] }
  0xac   :  { %v200_v23 = vpop.f32.mrf.mxu2  ;;  %v393_v14 = vld [vmem:[#allocation2 + $0x2b0] sm:$0xff] }
  0xad   :  { %v1461_v24 = vmax.f32 %v261_v20, 0.0  ;;  %v201_v25 = vadd.f32 %v200_v23, %v119_v18  ;;  %589 = vmatmul.f32.vlgmr.msrb.gmra.mxu2 %v1459_v19  ;;  %v525_v15 = vld [vmem:[#allocation2 + $0x6d0] sm:$0xff] }
  0xae   :  { %733 = vmatpush.msrb.mxu2 %v369_v21  ;;  %v280_v28 = vpop.f32.mrf.mxu3  ;;  %v300_v29 = vpop.f32.mrf.mxu0  ;;  %v445_v16 = vld [vmem:[#allocation2 + $0x450] sm:$0xff] }
  0xaf   :  { %v221_v30 = vadd.f32 %v220_v6, %v201_v25  ;;  %v281_v8 = vadd.f32 %v280_v28, %v121_v22  ;;  %629 = vmatmul.f32.vlgmr.msra.gmra.mxu0 %v1461_v24  ;;  %v533_v6 = vld [vmem:[#allocation2 + $0x710] sm:$0xff] }
  0xb0   :  { %773 = vmatpush.msra.mxu0 %v497_v26  ;;  %734 = vmatpush.msrb.mxu2 %v365_v27  ;;  %v313_v17 = vld [vmem:[#allocation2 + $0x30] sm:$0xff]  ;;  %v370_v27 = vld [vmem:[#allocation2 + $0x1f8] sm:$0xff] }
  0xb1   :  { %v1465_v33 = vmax.f32 %v221_v30, 0.0  ;;  %v301_v34 = vadd.f32 %v300_v29, %v281_v8  ;;  %v389_v18 = vld [vmem:[#allocation2 + $0x290] sm:$0xff]  ;;  %v498_v30 = vld [vmem:[#allocation2 + $0x5f8] sm:$0xff] }
  0xb2   :  { %774 = vmatpush.msra.mxu0 %v493_v31  ;;  %735 = vmatpush.msrb.mxu2 %v361_v32  ;;  %v521_v20 = vld [vmem:[#allocation2 + $0x6b0] sm:$0xff]  ;;  %v366_v8 = vld [vmem:[#allocation2 + $0x1d8] sm:$0xff] }
  0xb3   :  { %v1467_v38 = vmax.f32 %v301_v34, 0.0  ;;  %609 = vmatmul.f32.vlgmr.msra.gmra.mxu1 %v1465_v33  ;;  %v441_v21 = vld [vmem:[#allocation2 + $0x430] sm:$0xff]  ;;  %v494_v34 = vld [vmem:[#allocation2 + $0x5d8] sm:$0xff] }
  0xb4   :  { %775 = vmatpush.msra.mxu0 %v489_v35  ;;  %736 = vmatpush.msrb.mxu2 %v357_v36  ;;  %v309_v22 = vld [vmem:[#allocation2 + $0x10] sm:$0xff]  ;;  %v362_v35 = vld [vmem:[#allocation2 + $0x1b8] sm:$0xff] }
  0xb5   :  { %753 = vmatpush.msra.mxu1 %v433_v37  ;;  %649 = vmatmul.f32.vlgmr.msrb.gmra.mxu3 %v1467_v38  ;;  %v385_v23 = vld [vmem:[#allocation2 + $0x270] sm:$0xff] }
  0xb6   :  { %776 = vmatpush.msra.mxu0 %v485_v39  ;;  %669 = vmatmul.f32.vlgmr.msra.gmra.mxu2 %v1459_v19  ;;  %v517_v25 = vld [vmem:[#allocation2 + $0x690] sm:$0xff]  ;;  %v490_v39 = vld [vmem:[#allocation2 + $0x5b8] sm:$0xff] }
  0xb7   :  { %737 = vmatpush.msrb.mxu2 %v353_v40  ;;  %754 = vmatpush.msra.mxu1 %v429_v41  ;;  %v437_v26 = vld [vmem:[#allocation2 + $0x410] sm:$0xff]  ;;  %v358_v40 = vld [vmem:[#allocation2 + $0x198] sm:$0xff] }
  0xb8   :  { %793 = vmatpush.msrb.mxu3 %v561_v42  ;;  %709 = vmatmul.f32.vlgmr.msrb.gmra.mxu0 %v1461_v24  ;;  %v381_v28 = vld [vmem:[#allocation2 + $0x250] sm:$0xff]  ;;  %v434_v41 = vld [vmem:[#allocation2 + $0x3f8] sm:$0xff] }
  0xb9   :  { %777 = vmatpush.msra.mxu0 %v481_v43  ;;  %738 = vmatpush.msrb.mxu2 %v349_v44  ;;  %v513_v29 = vld [vmem:[#allocation2 + $0x670] sm:$0xff]  ;;  %v486_v43 = vld [vmem:[#allocation2 + $0x598] sm:$0xff] }
  0xba   :  { %755 = vmatpush.msra.mxu1 %v425_v45  ;;  %794 = vmatpush.msrb.mxu3 %v557_v46  ;;  %v377_v31 = vld [vmem:[#allocation2 + $0x230] sm:$0xff]  ;;  %v354_v44 = vld [vmem:[#allocation2 + $0x178] sm:$0xff] }
  0xbb   :  { %778 = vmatpush.msra.mxu0 %v477_v47  ;;  %739 = vmatpush.msrb.mxu2 %v345_v48  ;;  %v509_v32 = vld [vmem:[#allocation2 + $0x650] sm:$0xff]  ;;  %v430_v45 = vld [vmem:[#allocation2 + $0x3d8] sm:$0xff] }
  0xbc   :  { %756 = vmatpush.msra.mxu1 %v421_v49  ;;  %795 = vmatpush.msrb.mxu3 %v553_v50  ;;  %v373_v36 = vld [vmem:[#allocation2 + $0x210] sm:$0xff]  ;;  %v562_v46 = vld [vmem:[#allocation2 + $0x7f8] sm:$0xff] }
  0xbd   :  { %779 = vmatpush.msra.mxu0 %v473_v51  ;;  %689 = vmatmul.f32.vlgmr.msrb.gmra.mxu1 %v1465_v33  ;;  %v505_v37 = vld [vmem:[#allocation2 + $0x630] sm:$0xff]  ;;  %v482_v47 = vld [vmem:[#allocation2 + $0x578] sm:$0xff] }
  0xbe   :  { %740 = vmatpush.msrb.mxu2 %v341_v52  ;;  %757 = vmatpush.msra.mxu1 %v417_v53  ;;  %v501_v42 = vld [vmem:[#allocation2 + $0x610] sm:$0xff]  ;;  %v350_v48 = vld [vmem:[#allocation2 + $0x158] sm:$0xff] }
  0xbf   :  { %796 = vmatpush.msrb.mxu3 %v549_v54  ;;  %780 = vmatpush.msra.mxu0 %v469_v55  ;;  %v426_v49 = vld [vmem:[#allocation2 + $0x3b8] sm:$0xff] }
  0xc0   :  { %729 = vmatmul.f32.vlgmr.msra.gmra.mxu3 %v1467_v38  ;;  %741 = vmatpush.msrb.mxu2 %v337_v56  ;;  %v558_v50 = vld [vmem:[#allocation2 + $0x7d8] sm:$0xff] }
  0xc1   :  { %758 = vmatpush.msra.mxu1 %v413_v57  ;;  %797 = vmatpush.msrb.mxu3 %v545_v58  ;;  %v478_v51 = vld [vmem:[#allocation2 + $0x558] sm:$0xff] }
  0xc2   :  { %781 = vmatpush.msra.mxu0 %v465_v59  ;;  %742 = vmatpush.msrb.mxu2 %v333_v60  ;;  %v346_v52 = vld [vmem:[#allocation2 + $0x138] sm:$0xff] }
  0xc3   :  { %759 = vmatpush.msra.mxu1 %v409_v61  ;;  %798 = vmatpush.msrb.mxu3 %v541_v62  ;;  %v422_v53 = vld [vmem:[#allocation2 + $0x398] sm:$0xff] }
  0xc4   :  { %782 = vmatpush.msra.mxu0 %v461_v63  ;;  %743 = vmatpush.msrb.mxu2 %v329_v0  ;;  %v554_v54 = vld [vmem:[#allocation2 + $0x7b8] sm:$0xff] }
  0xc5   :  { %760 = vmatpush.msra.mxu1 %v405_v1  ;;  %799 = vmatpush.msrb.mxu3 %v537_v2  ;;  %v474_v55 = vld [vmem:[#allocation2 + $0x538] sm:$0xff] }
  0xc6   :  { %783 = vmatpush.msra.mxu0 %v457_v3  ;;  %744 = vmatpush.msrb.mxu2 %v325_v4  ;;  %v342_v56 = vld [vmem:[#allocation2 + $0x118] sm:$0xff] }
  0xc7   :  { %761 = vmatpush.msra.mxu1 %v401_v5  ;;  %800 = vmatpush.msrb.mxu3 %v533_v6  ;;  %v418_v57 = vld [vmem:[#allocation2 + $0x378] sm:$0xff] }
  0xc8   :  { %784 = vmatpush.msra.mxu0 %v453_v7  ;;  %745 = vmatpush.msrb.mxu2 %v321_v9  ;;  %v550_v58 = vld [vmem:[#allocation2 + $0x798] sm:$0xff] }
  0xc9   :  { %762 = vmatpush.msra.mxu1 %v397_v10  ;;  %801 = vmatpush.msrb.mxu3 %v529_v11  ;;  %v470_v59 = vld [vmem:[#allocation2 + $0x518] sm:$0xff] }
  0xca   :  { %785 = vmatpush.msra.mxu0 %v449_v12  ;;  %746 = vmatpush.msrb.mxu2 %v317_v13  ;;  %v338_v60 = vld [vmem:[#allocation2 + $0xf8] sm:$0xff] }
  0xcb   :  { %763 = vmatpush.msra.mxu1 %v393_v14  ;;  %802 = vmatpush.msrb.mxu3 %v525_v15  ;;  %v414_v61 = vld [vmem:[#allocation2 + $0x358] sm:$0xff] }
  0xcc   :  { %786 = vmatpush.msra.mxu0 %v445_v16  ;;  %747 = vmatpush.msrb.mxu2 %v313_v17  ;;  %v546_v62 = vld [vmem:[#allocation2 + $0x778] sm:$0xff] }
  0xcd   :  { %764 = vmatpush.msra.mxu1 %v389_v18  ;;  %803 = vmatpush.msrb.mxu3 %v521_v20  ;;  %v466_v63 = vld [vmem:[#allocation2 + $0x4f8] sm:$0xff] }
  0xce   :  { %787 = vmatpush.msra.mxu0 %v441_v21  ;;  %748 = vmatpush.msrb.mxu2 %v309_v22  ;;  %v334_v0 = vld [vmem:[#allocation2 + $0xd8] sm:$0xff] }
  0xcf   :  { %765 = vmatpush.msra.mxu1 %v385_v23  ;;  %804 = vmatpush.msrb.mxu3 %v517_v25  ;;  %v410_v1 = vld [vmem:[#allocation2 + $0x338] sm:$0xff] }
  0xd0   :  { %749 = vmatmul.f32.vlgmr.msrb.gmra.mxu2 %v1459_v19  ;;  %788 = vmatpush.msra.mxu0 %v437_v26  ;;  %v542_v2 = vld [vmem:[#allocation2 + $0x758] sm:$0xff] }
  0xd1   :  { %813 = vmatpush.msra.mxu2 %v370_v27  ;;  %766 = vmatpush.msra.mxu1 %v381_v28  ;;  %v462_v3 = vld [vmem:[#allocation2 + $0x4d8] sm:$0xff] }
  0xd2   :  { %789 = vmatmul.f32.vlgmr.msra.gmra.mxu0 %v1461_v24  ;;  %805 = vmatpush.msrb.mxu3 %v513_v29  ;;  %v330_v4 = vld [vmem:[#allocation2 + $0xb8] sm:$0xff] }
  0xd3   :  { %853 = vmatpush.msrb.mxu0 %v498_v30  ;;  %814 = vmatpush.msra.mxu2 %v366_v8  ;;  %v406_v5 = vld [vmem:[#allocation2 + $0x318] sm:$0xff] }
  0xd4   :  { %767 = vmatpush.msra.mxu1 %v377_v31  ;;  %806 = vmatpush.msrb.mxu3 %v509_v32  ;;  %v538_v6 = vld [vmem:[#allocation2 + $0x738] sm:$0xff] }
  0xd5   :  { %854 = vmatpush.msrb.mxu0 %v494_v34  ;;  %815 = vmatpush.msra.mxu2 %v362_v35  ;;  %v458_v7 = vld [vmem:[#allocation2 + $0x4b8] sm:$0xff] }
  0xd6   :  { %768 = vmatpush.msra.mxu1 %v373_v36  ;;  %807 = vmatpush.msrb.mxu3 %v505_v37  ;;  %v326_v9 = vld [vmem:[#allocation2 + $0x98] sm:$0xff]  ;;  %v911_v36 = vld [vmem:[%s1721_s5 + $0x70] sm:$0xff] }
  0xd7   :  { %855 = vmatpush.msrb.mxu0 %v490_v39  ;;  %769 = vmatmul.f32.vlgmr.msra.gmra.mxu1 %v1465_v33  ;;  %v402_v10 = vld [vmem:[#allocation2 + $0x2f8] sm:$0xff] }
  0xd8   :  { %816 = vmatpush.msra.mxu2 %v358_v40  ;;  %833 = vmatpush.msrb.mxu1 %v434_v41  ;;  %v534_v11 = vld [vmem:[#allocation2 + $0x718] sm:$0xff]  ;;  %v909_v41 = vld [vmem:[%s1721_s5 + $0x60] sm:$0xff] }
  0xd9   :  { %808 = vmatpush.msrb.mxu3 %v501_v42  ;;  %856 = vmatpush.msrb.mxu0 %v486_v43  ;;  %v454_v12 = vld [vmem:[#allocation2 + $0x498] sm:$0xff]  ;;  %v927_v42 = vld [vmem:[%s1721_s5 + $0xf0] sm:$0xff] }
  0xda   :  { %809 = vmatmul.f32.vlgmr.msrb.gmra.mxu3 %v1467_v38  ;;  %817 = vmatpush.msra.mxu2 %v354_v44  ;;  %v322_v13 = vld [vmem:[#allocation2 + $0x78] sm:$0xff]  ;;  %v907_v44 = vld [vmem:[%s1721_s5 + $0x50] sm:$0xff] }
  0xdb   :  { %834 = vmatpush.msrb.mxu1 %v430_v45  ;;  %873 = vmatpush.msra.mxu3 %v562_v46  ;;  %v398_v14 = vld [vmem:[#allocation2 + $0x2d8] sm:$0xff]  ;;  %v906_v45 = vld [vmem:[%s1721_s5 + $0x48] sm:$0xff]  ;;  %v925_v46 = vld [vmem:[%s1721_s5 + $0xe0] sm:$0xff] }
  0xdc   :  { %857 = vmatpush.msrb.mxu0 %v482_v47  ;;  %818 = vmatpush.msra.mxu2 %v350_v48  ;;  %v530_v15 = vld [vmem:[#allocation2 + $0x6f8] sm:$0xff] }
  0xdd   :  { %835 = vmatpush.msrb.mxu1 %v426_v49  ;;  %874 = vmatpush.msra.mxu3 %v558_v50  ;;  %v450_v16 = vld [vmem:[#allocation2 + $0x478] sm:$0xff]  ;;  %v903_v49 = vld [vmem:[%s1721_s5 + $0x30] sm:$0xff] }
  0xde   :  { %858 = vmatpush.msrb.mxu0 %v478_v51  ;;  %819 = vmatpush.msra.mxu2 %v346_v52  ;;  %v318_v17 = vld [vmem:[#allocation2 + $0x58] sm:$0xff]  ;;  %v923_v50 = vld [vmem:[%s1721_s5 + $0xd0] sm:$0xff]  ;;  %v902_v51 = vld [vmem:[%s1721_s5 + $0x28] sm:$0xff] }
  0xdf   :  { %836 = vmatpush.msrb.mxu1 %v422_v53  ;;  %875 = vmatpush.msra.mxu3 %v554_v54  ;;  %v394_v18 = vld [vmem:[#allocation2 + $0x2b8] sm:$0xff]  ;;  %v922_v52 = vld [vmem:[%s1721_s5 + $0xc8] sm:$0xff]  ;;  %v901_v53 = vld [vmem:[%s1721_s5 + $0x20] sm:$0xff] }
  0xe0   :  { %859 = vmatpush.msrb.mxu0 %v474_v55  ;;  %820 = vmatpush.msra.mxu2 %v342_v56  ;;  %v526_v20 = vld [vmem:[#allocation2 + $0x6d8] sm:$0xff]  ;;  %v921_v54 = vld [vmem:[%s1721_s5 + $0xc0] sm:$0xff] }
  0xe1   :  { %837 = vmatpush.msrb.mxu1 %v418_v57  ;;  %876 = vmatpush.msra.mxu3 %v550_v58  ;;  %v446_v21 = vld [vmem:[#allocation2 + $0x458] sm:$0xff]  ;;  %v899_v57 = vld [vmem:[%s1721_s5 + $0x10] sm:$0xff] }
  0xe2   :  { %860 = vmatpush.msrb.mxu0 %v470_v59  ;;  %821 = vmatpush.msra.mxu2 %v338_v60  ;;  %v314_v22 = vld [vmem:[#allocation2 + $0x38] sm:$0xff]  ;;  %v919_v58 = vld [vmem:[%s1721_s5 + $0xb0] sm:$0xff]  ;;  %v898_v59 = vld [vmem:[%s1721_s5 + $0x8] sm:$0xff] }
  0xe3   :  { %838 = vmatpush.msrb.mxu1 %v414_v61  ;;  %877 = vmatpush.msra.mxu3 %v546_v62  ;;  %v390_v23 = vld [vmem:[#allocation2 + $0x298] sm:$0xff]  ;;  %v918_v60 = vld [vmem:[%s1721_s5 + $0xa8] sm:$0xff]  ;;  %v897_v61 = vld [vmem:[%s1721_s5] sm:$0xff] }
  0xe4   :  { %861 = vmatpush.msrb.mxu0 %v466_v63  ;;  %822 = vmatpush.msra.mxu2 %v334_v0  ;;  %v522_v25 = vld [vmem:[#allocation2 + $0x6b8] sm:$0xff]  ;;  %v917_v62 = vld [vmem:[%s1721_s5 + $0xa0] sm:$0xff]  ;;  %v943_v0 = vld [vmem:[%s1721_s5 + $0x170] sm:$0xff] }
  0xe5   :  { %839 = vmatpush.msrb.mxu1 %v410_v1  ;;  %878 = vmatpush.msra.mxu3 %v542_v2  ;;  %v442_v26 = vld [vmem:[#allocation2 + $0x438] sm:$0xff]  ;;  %v915_v2 = vld [vmem:[%s1721_s5 + $0x90] sm:$0xff] }
  0xe6   :  { %862 = vmatpush.msrb.mxu0 %v462_v3  ;;  %823 = vmatpush.msra.mxu2 %v330_v4  ;;  %v310_v27 = vld [vmem:[#allocation2 + $0x18] sm:$0xff]  ;;  %v942_v3 = vld [vmem:[%s1721_s5 + $0x168] sm:$0xff] }
  0xe7   :  { %840 = vmatpush.msrb.mxu1 %v406_v5  ;;  %879 = vmatpush.msra.mxu3 %v538_v6  ;;  %v386_v28 = vld [vmem:[#allocation2 + $0x278] sm:$0xff]  ;;  %v914_v4 = vld [vmem:[%s1721_s5 + $0x88] sm:$0xff]  ;;  %v941_v5 = vld [vmem:[%s1721_s5 + $0x160] sm:$0xff] }
  0xe8   :  { %863 = vmatpush.msrb.mxu0 %v458_v7  ;;  %824 = vmatpush.msra.mxu2 %v326_v9  ;;  %v518_v29 = vld [vmem:[#allocation2 + $0x698] sm:$0xff]  ;;  %v913_v6 = vld [vmem:[%s1721_s5 + $0x80] sm:$0xff] }
  0xe9   :  { %841 = vmatpush.msrb.mxu1 %v402_v10  ;;  %880 = vmatpush.msra.mxu3 %v534_v11  ;;  %v438_v30 = vld [vmem:[#allocation2 + $0x418] sm:$0xff]  ;;  %v1597_v9 = vld [vmem:[%s1720_s4] sm:$0xf]  ;;  %v939_v10 = vld [vmem:[%s1721_s5 + $0x150] sm:$0xff] }
  0xea   :  { %864 = vmatpush.msrb.mxu0 %v454_v12  ;;  %825 = vmatpush.msra.mxu2 %v322_v13  ;;  %v382_v8 = vld [vmem:[#allocation2 + $0x258] sm:$0xff]  ;;  %v938_v11 = vld [vmem:[%s1721_s5 + $0x148] sm:$0xff]  ;;  %v565_v12 = vperm.slane %v1597_v9, 0  ;;  %v937_v13 = vld [vmem:[%s1721_s5 + $0x140] sm:$0xff] }
  0xeb   :  { %842 = vmatpush.msrb.mxu1 %v398_v14  ;;  %881 = vmatpush.msra.mxu3 %v530_v15  ;;  %v514_v31 = vld [vmem:[#allocation2 + $0x678] sm:$0xff] }
  0xec   :  { %865 = vmatpush.msrb.mxu0 %v450_v16  ;;  %826 = vmatpush.msra.mxu2 %v318_v17  ;;  %v912_v32 = vld [vmem:[%s1721_s5 + $0x78] sm:$0xff] }
  0xed   :  { %843 = vmatpush.msrb.mxu1 %v394_v18  ;;  %882 = vmatpush.msra.mxu3 %v526_v20  ;;  %v378_v34 = vld [vmem:[#allocation2 + $0x238] sm:$0xff] }
  0xee   :  { %866 = vmatpush.msrb.mxu0 %v446_v21  ;;  %827 = vmatpush.msra.mxu2 %v314_v22  ;;  %v510_v35 = vld [vmem:[#allocation2 + $0x658] sm:$0xff]  ;;  %v566_v21 = vperm.slane %v1597_v9, 1  ;;  %v935_v22 = vld [vmem:[%s1721_s5 + $0x130] sm:$0xff] }
  0xef   :  { %844 = vmatpush.msrb.mxu1 %v390_v23  ;;  %883 = vmatpush.msra.mxu3 %v522_v25  ;;  %v374_v37 = vld [vmem:[#allocation2 + $0x218] sm:$0xff]  ;;  %v934_v23 = vld [vmem:[%s1721_s5 + $0x128] sm:$0xff] }
  0xf0   :  { %867 = vmatpush.msrb.mxu0 %v442_v26  ;;  %828 = vmatpush.msra.mxu2 %v310_v27  ;;  %v506_v39 = vld [vmem:[#allocation2 + $0x638] sm:$0xff]  ;;  %v933_v27 = vld [vmem:[%s1721_s5 + $0x120] sm:$0xff] }
  0xf1   :  { %845 = vmatpush.msrb.mxu1 %v386_v28  ;;  %884 = vmatpush.msra.mxu3 %v518_v29  ;;  %v502_v40 = vld [vmem:[#allocation2 + $0x618] sm:$0xff] }
  0xf2   :  { %829 = vmatmul.f32.vlgmr.msra.gmra.mxu2 %v1459_v19  ;;  %868 = vmatpush.msrb.mxu0 %v438_v30  ;;  %v910_v19 = vld [vmem:[%s1721_s5 + $0x68] sm:$0xff]  ;;  %v908_v43 = vld [vmem:[%s1721_s5 + $0x58] sm:$0xff] }
  0xf3   :  { %846 = vmatpush.msrb.mxu1 %v382_v8  ;;  %869 = vmatmul.f32.vlgmr.msrb.gmra.mxu0 %v1461_v24  ;;  %v928_v24 = vld [vmem:[%s1721_s5 + $0xf8] sm:$0xff] }
  0xf4   :  { %885 = vmatpush.msra.mxu3 %v514_v31  ;;  %965 = vmatpush.msrb.mxu2 %v912_v32  ;;  %v904_v47 = vld [vmem:[%s1721_s5 + $0x38] sm:$0xff] }
  0xf5   :  { %847 = vmatpush.msrb.mxu1 %v378_v34  ;;  %v924_v48 = vld [vmem:[%s1721_s5 + $0xd8] sm:$0xff] }
  0xf6   :  { %886 = vmatpush.msra.mxu3 %v510_v35  ;;  %966 = vmatpush.msrb.mxu2 %v911_v36  ;;  %v900_v55 = vld [vmem:[%s1721_s5 + $0x18] sm:$0xff]  ;;  %v931_v35 = vld [vmem:[%s1721_s5 + $0x110] sm:$0xff]  ;;  %v930_v36 = vld [vmem:[%s1721_s5 + $0x108] sm:$0xff] }
  0xf7   :  { %848 = vmatpush.msrb.mxu1 %v374_v37  ;;  %v920_v56 = vld [vmem:[%s1721_s5 + $0xb8] sm:$0xff]  ;;  %v929_v37 = vld [vmem:[%s1721_s5 + $0x100] sm:$0xff] }
  0xf8   :  { %887 = vmatpush.msra.mxu3 %v506_v39  ;;  %849 = vmatmul.f32.vlgmr.msrb.gmra.mxu1 %v1465_v33  ;;  %v926_v33 = vld [vmem:[%s1721_s5 + $0xe8] sm:$0xff]  ;;  %v944_v63 = vld [vmem:[%s1721_s5 + $0x178] sm:$0xff] }
  0xf9   :  { %967 = vmatpush.msrb.mxu2 %v910_v19  ;;  %985 = vmatpush.msra.mxu1 %v928_v24  ;;  %v916_v1 = vld [vmem:[%s1721_s5 + $0x98] sm:$0xff] }
  0xfa   :  { %888 = vmatpush.msra.mxu3 %v502_v40  ;;  %1005 = vmatpush.msra.mxu0 %v944_v63  ;;  %v940_v7 = vld [vmem:[%s1721_s5 + $0x158] sm:$0xff]  ;;  %v959_v40 = vld [vmem:[%s1721_s5 + $0x1f0] sm:$0xff]  ;;  %v946_v63 = vld [vmem:[%s1721_s5 + $0x188] sm:$0xff] }
  0xfb   :  { %889 = vmatmul.f32.vlgmr.msra.gmra.mxu3 %v1467_v38  ;;  %968 = vmatpush.msrb.mxu2 %v909_v41  ;;  %v905_v38 = vld [vmem:[%s1721_s5 + $0x40] sm:$0xff]  ;;  %v936_v15 = vld [vmem:[%s1721_s5 + $0x138] sm:$0xff] }
  0xfc   :  { %986 = vmatpush.msra.mxu1 %v927_v42  ;;  %1006 = vmatpush.msra.mxu0 %v943_v0  ;;  %v932_v8 = vld [vmem:[%s1721_s5 + $0x118] sm:$0xff] }
  0xfd   :  { %969 = vmatpush.msrb.mxu2 %v908_v43  ;;  %v960_v24 = vld [vmem:[%s1721_s5 + $0x1f8] sm:$0xff]  ;;  %v958_v43 = vld [vmem:[%s1721_s5 + $0x1e8] sm:$0xff] }
  0xfe   :  { %987 = vmatpush.msra.mxu1 %v926_v33  ;;  %1007 = vmatpush.msra.mxu0 %v942_v3 }
  0xff   :  { %970 = vmatpush.msrb.mxu2 %v907_v44  ;;  %1025 = vmatpush.msrb.mxu3 %v960_v24  ;;  %v957_v44 = vld [vmem:[%s1721_s5 + $0x1e0] sm:$0xff] }
 0x100   :  { %988 = vmatpush.msra.mxu1 %v925_v46  ;;  %1008 = vmatpush.msra.mxu0 %v941_v5  ;;  %v954_v46 = vld [vmem:[%s1721_s5 + $0x1c8] sm:$0xff] }
 0x101   :  { %971 = vmatpush.msrb.mxu2 %v906_v45  ;;  %1026 = vmatpush.msrb.mxu3 %v959_v40  ;;  %v956_v45 = vld [vmem:[%s1721_s5 + $0x1d8] sm:$0xff] }
 0x102   :  { %989 = vmatpush.msra.mxu1 %v924_v48  ;;  %1009 = vmatpush.msra.mxu0 %v940_v7  ;;  %v953_v48 = vld [vmem:[%s1721_s5 + $0x1c0] sm:$0xff] }
 0x103   :  { %972 = vmatpush.msrb.mxu2 %v905_v38  ;;  %1027 = vmatpush.msrb.mxu3 %v958_v43  ;;  %v955_v38 = vld [vmem:[%s1721_s5 + $0x1d0] sm:$0xff] }
 0x104   :  { %990 = vmatpush.msra.mxu1 %v923_v50  ;;  %1010 = vmatpush.msra.mxu0 %v939_v10 }
 0x105   :  { %973 = vmatpush.msrb.mxu2 %v904_v47  ;;  %1028 = vmatpush.msrb.mxu3 %v957_v44  ;;  %v567_v47 = vperm.slane %v1597_v9, 2 }
 0x106   :  { %991 = vmatpush.msra.mxu1 %v922_v52  ;;  %1011 = vmatpush.msra.mxu0 %v938_v11  ;;  %v951_v52 = vld [vmem:[%s1721_s5 + $0x1b0] sm:$0xff] }
 0x107   :  { %974 = vmatpush.msrb.mxu2 %v903_v49  ;;  %1029 = vmatpush.msrb.mxu3 %v956_v45  ;;  %v952_v49 = vld [vmem:[%s1721_s5 + $0x1b8] sm:$0xff] }
 0x108   :  { %992 = vmatpush.msra.mxu1 %v921_v54  ;;  %1012 = vmatpush.msra.mxu0 %v937_v13  ;;  %v950_v54 = vld [vmem:[%s1721_s5 + $0x1a8] sm:$0xff] }
 0x109   :  { %975 = vmatpush.msrb.mxu2 %v902_v51  ;;  %1030 = vmatpush.msrb.mxu3 %v955_v38 }
 0x10a   :  { %993 = vmatpush.msra.mxu1 %v920_v56  ;;  %1013 = vmatpush.msra.mxu0 %v936_v15  ;;  %v949_v56 = vld [vmem:[%s1721_s5 + $0x1a0] sm:$0xff]  ;;  %v1052_v15 = vld [vmem:[%s1723_s7 + $0x30] sm:$0xff] }
 0x10b   :  { %976 = vmatpush.msrb.mxu2 %v901_v53  ;;  %1031 = vmatpush.msrb.mxu3 %v954_v46 }
 0x10c   :  { %994 = vmatpush.msra.mxu1 %v919_v58  ;;  %1014 = vmatpush.msra.mxu0 %v935_v22  ;;  %v1125_v22 = vld [vmem:[%s1722_s6] ss:$0 sm:$0xff]  ;;  %s1183_s6 = smov [#allocation5]  }
 0x10d   :  { %977 = vmatpush.msrb.mxu2 %v900_v55  ;;  %1032 = vmatpush.msrb.mxu3 %v953_v48 }
 0x10e   :  { %995 = vmatpush.msra.mxu1 %v918_v60  ;;  %1015 = vmatpush.msra.mxu0 %v934_v23 }
 0x10f   :  { %978 = vmatpush.msrb.mxu2 %v899_v57  ;;  %1033 = vmatpush.msrb.mxu3 %v952_v49  ;;  %v948_v57 = vld [vmem:[%s1721_s5 + $0x198] sm:$0xff] }
 0x110   :  { %996 = vmatpush.msra.mxu1 %v917_v62  ;;  %1016 = vmatpush.msra.mxu0 %v933_v27 }
 0x111   :  { %979 = vmatpush.msrb.mxu2 %v898_v59  ;;  %1034 = vmatpush.msrb.mxu3 %v951_v52 }
 0x112   :  { %997 = vmatpush.msra.mxu1 %v916_v1  ;;  %1017 = vmatpush.msra.mxu0 %v932_v8  ;;  %v945_v1 = vld [vmem:[%s1721_s5 + $0x180] sm:$0xff] }
 0x113   :  { %980 = vmatpush.msrb.mxu2 %v897_v61  ;;  %1035 = vmatpush.msrb.mxu3 %v950_v54  ;;  %v947_v61 = vld [vmem:[%s1721_s5 + $0x190] sm:$0xff] }
 0x114   :  { %998 = vmatpush.msra.mxu1 %v915_v2  ;;  %1018 = vmatpush.msra.mxu0 %v931_v35  ;;  %v568_v2 = vperm.slane %v1597_v9, 3  ;;  %v1051_v9 = vld [vmem:[%s1723_s7 + $0x28] sm:$0xff] }
 0x115   :  { %1036 = vmatpush.msrb.mxu3 %v949_v56 }
 0x116   :  { %999 = vmatpush.msra.mxu1 %v914_v4  ;;  %1019 = vmatpush.msra.mxu0 %v930_v36 }
 0x117   :  { %1037 = vmatpush.msrb.mxu3 %v948_v57 }
 0x118   :  { %1000 = vmatpush.msra.mxu1 %v913_v6  ;;  %1020 = vmatpush.msra.mxu0 %v929_v37 }
 0x119   :  { %1038 = vmatpush.msrb.mxu3 %v947_v61 }
 0x11b   :  { %1039 = vmatpush.msrb.mxu3 %v946_v63 }
 0x11d   :  { %1040 = vmatpush.msrb.mxu3 %v945_v1 }
 0x12c   :  { %v630_v20 = vpop.f32.mrf.mxu0 }
 0x130   :  { %v590_v14 = vpop.f32.mrf.mxu2  ;;  %v610_v17 = vpop.f32.mrf.mxu1 }
 0x131   :  { %v591_v16 = vadd.f32 %v590_v14, %v565_v12  ;;  %v1053_v14 = vld [vmem:[%s1723_s7 + $0x38] sm:$0xff] }
 0x132   :  { %1066 = vmatpush.msra.mxu2 %v1053_v14 }
 0x133   :  { %v611_v18 = vadd.f32 %v610_v17, %v591_v16  ;;  %v1050_v16 = vld [vmem:[%s1723_s7 + $0x20] sm:$0xff]  ;;  %v1049_v17 = vld [vmem:[%s1723_s7 + $0x18] sm:$0xff] }
 0x134   :  { %1067 = vmatpush.msra.mxu2 %v1052_v15 }
 0x135   :  { %v631_v25 = vadd.f32 %v630_v20, %v611_v18  ;;  %v710_v39 = vpop.f32.mrf.mxu0  ;;  %v1048_v18 = vld [vmem:[%s1723_s7 + $0x10] sm:$0xff]  ;;  %v1047_v20 = vld [vmem:[%s1723_s7 + $0x8] sm:$0xff] }
 0x136   :  { %1068 = vmatpush.msra.mxu2 %v1051_v9 }
 0x138   :  { %v650_v26 = vpop.f32.mrf.mxu3  ;;  %1069 = vmatpush.msra.mxu2 %v1050_v16 }
 0x139   :  { %v651_v28 = vadd.f32 %v650_v26, %v631_v25  ;;  %v670_v29 = vpop.f32.mrf.mxu2 }
 0x13a   :  { %v671_v30 = vadd.f32 %v670_v29, %v566_v21  ;;  %v690_v32 = vpop.f32.mrf.mxu1  ;;  %1070 = vmatpush.msra.mxu2 %v1049_v17  ;;  %v1046_v21 = vld [vmem:[%s1723_s7] sm:$0xff]  ;;  %s1100_s7 = sshll.u32 %s1183_s6, 4  ;;  %s1101_s7 = int_to_ptr.vmem [resolvable:$true] %s1100_s7 }
 0x13b   :  { %v893_v31 = vmax.f32 %v651_v28, 0.0 }
 0x13c   :  { %v691_v34 = vadd.f32 %v690_v32, %v671_v30  ;;  %1071 = vmatpush.msra.mxu2 %v1048_v18 }
 0x13d   :  { %981 = vmatmul.f32.vlgmr.msrb.gmra.mxu2 %v893_v31 }
 0x13e   :  { %v711_v19 = vadd.f32 %v710_v39, %v691_v34  ;;  %1072 = vmatpush.msra.mxu2 %v1047_v20  ;;  %v1089_v39 = vlaneseq }
 0x140   :  { %1073 = vmatpush.msra.mxu2 %v1046_v21  ;;  %v1090_v40 = vand.u32 127, %v1089_v39 }
 0x142   :  { %vm1091_vm6 = vcmp.lt.s32.totalorder %v1090_v40, 56 }
 0x143   :  { %v730_v41 = vpop.f32.mrf.mxu3 }
 0x144   :  { %v731_v42 = vadd.f32 %v730_v41, %v711_v19 }
 0x146   :  { %v894_v33 = vmax.f32 %v731_v42, 0.0 }
 0x148   :  { %1001 = vmatmul.f32.vlgmr.msra.gmra.mxu1 %v894_v33 }
 0x14f   :  { %v790_v58 = vpop.f32.mrf.mxu0 }
 0x153   :  { %v750_v50 = vpop.f32.mrf.mxu2 }
 0x154   :  { %v751_v51 = vadd.f32 %v750_v50, %v567_v47  ;;  %v770_v53 = vpop.f32.mrf.mxu1 }
 0x156   :  { %v771_v55 = vadd.f32 %v770_v53, %v751_v51 }
 0x158   :  { %v791_v59 = vadd.f32 %v790_v58, %v771_v55 }
 0x15d   :  { %v810_v60 = vpop.f32.mrf.mxu3 }
 0x15e   :  { %v811_v62 = vadd.f32 %v810_v60, %v791_v59 }
 0x160   :  { %v895_v0 = vmax.f32 %v811_v62, 0.0 }
 0x162   :  { %1021 = vmatmul.f32.vlgmr.msra.gmra.mxu0 %v895_v0 }
 0x170   :  { %v870_v7 = vpop.f32.mrf.mxu0 }
 0x175   :  { %v830_v3 = vpop.f32.mrf.mxu2  ;;  %v850_v5 = vpop.f32.mrf.mxu1 }
 0x176   :  { %v831_v4 = vadd.f32 %v830_v3, %v568_v2 }
 0x178   :  { %v851_v6 = vadd.f32 %v850_v5, %v831_v4 }
 0x17a   :  { %v871_v10 = vadd.f32 %v870_v7, %v851_v6 }
 0x17e   :  { %v890_v11 = vpop.f32.mrf.mxu3 }
 0x17f   :  { %v891_v12 = vadd.f32 %v890_v11, %v871_v10 }
 0x181   :  { %v896_v13 = vmax.f32 %v891_v12, 0.0 }
 0x183   :  { %1041 = vmatmul.f32.vlgmr.msrb.gmra.mxu3 %v896_v13 }
 0x1c0   :  { %v982_v23 = vpop.f32.mrf.mxu2 }
 0x1c1   :  { %v983_v25 = vadd.f32 %v1125_v22, %v982_v23 }
 0x1c5   :  { %v1002_v26 = vpop.f32.mrf.mxu1 }
 0x1c6   :  { %v1003_v28 = vadd.f32 %v1002_v26, %v983_v25 }
 0x1df   :  { %v1022_v27 = vpop.f32.mrf.mxu0 }
 0x1e0   :  { %v1023_v29 = vadd.f32 %v1022_v27, %v1003_v28 }
 0x206   :  { %v1042_v30 = vpop.f32.mrf.mxu3 }
 0x207   :  { %v1043_v8 = vadd.f32 %v1042_v30, %v1023_v29 }
 0x209   :  { %v1045_v31 = vmul.f32 %v1043_v8, %v1043_v8 }
 0x20b   :  { %1120 = vmatmul.msk.f32.vlgmr.msra.gmra.mxu2 %vm1054_vm2, %v1045_v31 }
 0x28e   :  { %v1075_v32 = vpop.f32.mrf.mxu2 }
 0x28f   :  { %v1078_v34 = vmax.f32 %v1075_v32, 1e-24 }
 0x291   :  { %1126 = vrsqrt.f32 %v1078_v34  ;;  %vm1085_vm4 = vweird.f32 %v1078_v34 }
 0x297   :  { %v1127_v35 = vpop.eup %1126 }
 0x298   :  { %v1080_v36 = vmul.f32 %v1127_v35, %v1078_v34  ;;  %vm1086_vm3 = vweird.f32 %v1127_v35 }
 0x299   :  { %vm1087_vm5 = vmor %vm1085_vm4, %vm1086_vm3 }
 0x29a   :  { %v1081_v37 = vmul.f32 %v1127_v35, %v1080_v36 }
 0x29c   :  { %v1082_v19 = vmul.f32 0.5, %v1081_v37 }
 0x29e   :  { %v1083_v24 = vsub.f32 1.5, %v1082_v19 }
 0x2a0   :  { %v1084_v41 = vmul.f32 %v1127_v35, %v1083_v24 }
 0x2a2   :  { %v1088_v42 = vsel %vm1087_vm5, %v1127_v35, %v1084_v41 }
 0x2a3   :  { %v1092_v43 = vmul.f32 %v1088_v42, %v1043_v8 }
 0x2a5   :  { %v1093_v33 = vsel %vm1091_vm6, %v1092_v43, %v1043_v8 }
 0x2a6   :  { %1094 = vst.msk [vmem:[#allocation5] sm:$0xff] %vm1054_vm2, %v1093_v33 }
 0x2a7   :  { %1105 = dma.vmem_to_hbm [thread:$0]  %s1101_s7, 128, %s1103_s28, [#allocation4]  }
 0x2a8   :  { %1178 = dma.done.wait [#allocation4], 128  }
 0x2a9   :  { %1179 = vsyncadd [#allocation4], 4294967168 }
 0x2aa   :  { %1110 = vsyncpa [#allocation3], 1 }
 0x2ab   :  { %1111 = vsyncpa [#allocation4], 1 }

</bundles_post_ra>
